<compile_context>
chip_gen: v7x
topology: tpu7x:2x2x1
jax: 0.10.0
libtpu: 0.0.40
codegen_flags: <defaults>
</compile_context>

<pallas_src>
import jax
import jax.numpy as jnp
from jax.experimental import pallas as pl
from jax.experimental.pallas import tpu as pltpu

# ---- shrunk "bert-base-uncased"-like config (synthetic, deterministic init) ----
VOCAB = 100          # vocab_size (shrunk)
MAX_POS = 16         # max_position_embeddings (shrunk)
TYPE_VOCAB = 2
BATCH = 2
SEQ = 8
HIDDEN = 32          # config.BERT_HIDDEN_SIZE (D_in)
N_HEADS = 4
HEAD_DIM = HIDDEN // N_HEADS
INTERMEDIATE = 64
N_LAYERS = 2
CLS_HIDDEN = 16      # config.CLASSIFIER_HIDDEN_SIZE (H)
N_LABEL = 4          # config.N_LABEL (D_out)
LN_EPS = 1e-12       # BERT layernorm eps
LANE = 128           # lane-dense padded output width


def _layer_norm(x, g, b, eps=LN_EPS):
    mu = jnp.mean(x, axis=-1, keepdims=True)
    var = jnp.mean((x - mu) ** 2, axis=-1, keepdims=True)
    return (x - mu) * jax.lax.rsqrt(var + eps) * g + b


def _gelu(x):
    # TODO(synk): HF BERT uses exact erf-GELU; tanh approximation used here (EUP-friendly).
    c = jnp.float32(0.7978845608028654)  # sqrt(2/pi)
    return 0.5 * x * (1.0 + jnp.tanh(c * (x + 0.044715 * x * x * x)))


# -------------------- fused kernel: embeddings-LN + encoder stack + classifier --------------------

def fused_bert_kernel(emb_ref, negmask_ref, eg_ref, eb_ref,
                      wqkv_ref, bqkv_ref, wo_ref, bo_ref, ln1g_ref, ln1b_ref,
                      w1_ref, b1_ref, w2_ref, b2_ref, ln2g_ref, ln2b_ref,
                      cw1_ref, cb1_ref, cw2_ref, cb2_ref,
                      o_ref):
    S, H = SEQ, HIDDEN

    # Embedding LayerNorm (per batch element; grid axis 0 = batch).
    x = _layer_norm(emb_ref[0], eg_ref[...], eb_ref[...])          # (S, H)
    neg = negmask_ref[0]                                           # (1, S) additive mask

    # Static unroll over layers; all stacked weights are VMEM-resident across the loop.
    for l in range(N_LAYERS):
        # Fused QKV projection: one (S,H) @ (H,3H) matmul (scale folded into Wq at init).
        qkv = jnp.dot(x, wqkv_ref[l], preferred_element_type=jnp.float32) + bqkv_ref[l]   # (S, 3H)
        q = jnp.transpose(qkv[:, 0 * H:1 * H].reshape(S, N_HEADS, HEAD_DIM), (1, 0, 2))   # (NH,S,HD)
        k = jnp.transpose(qkv[:, 1 * H:2 * H].reshape(S, N_HEADS, HEAD_DIM), (1, 0, 2))
        v = jnp.transpose(qkv[:, 2 * H:3 * H].reshape(S, N_HEADS, HEAD_DIM), (1, 0, 2))

        # Batched attention over all heads (no per-head loop / concat).
        s = jnp.einsum('nqd,nkd->nqk', q, k,
                       preferred_element_type=jnp.float32)          # (NH, S, S)
        s = s + neg[None, :, :]                                     # mask over keys
        m = jnp.max(s, axis=-1, keepdims=True)
        p = jnp.exp(s - m)
        p = p * pl.reciprocal(jnp.sum(p, axis=-1, keepdims=True), approx=True)
        ctx = jnp.einsum('nqk,nkd->nqd', p, v,
                         preferred_element_type=jnp.float32)        # (NH, S, HD)
        ctx = jnp.transpose(ctx, (1, 0, 2)).reshape(S, H)           # (S, H)

        attn = jnp.dot(ctx, wo_ref[l], preferred_element_type=jnp.float32) + bo_ref[l]
        x = _layer_norm(x + attn, ln1g_ref[l], ln1b_ref[l])

        hmid = _gelu(jnp.dot(x, w1_ref[l], preferred_element_type=jnp.float32) + b1_ref[l])
        ffn = jnp.dot(hmid, w2_ref[l], preferred_element_type=jnp.float32) + b2_ref[l]
        x = _layer_norm(x + ffn, ln2g_ref[l], ln2b_ref[l])

    # Classifier head on the CLS token. Weights are zero-padded to 128 output lanes so the
    # final store is a full-lane (unmasked) vst.
    cls = x[0:1, :]                                                 # (1, H)
    h = jnp.dot(cls, cw1_ref[...], preferred_element_type=jnp.float32) + cb1_ref[...]
    h = jnp.maximum(h, 0.0)
    logits = jnp.dot(h, cw2_ref[...], preferred_element_type=jnp.float32) + cb2_ref[...]  # (1, LANE)
    o_ref[...] = logits[None]                                       # (1, 1, LANE)


# -------------------- parameters (deterministic synthetic init) --------------------

def init_params(key):
    keys = iter(jax.random.split(key, 64))

    def nrm(shape, scale=0.02):
        return scale * jax.random.normal(next(keys), shape, dtype=jnp.float32)

    inv_sqrt = jnp.float32(1.0 / (HEAD_DIM ** 0.5))

    params = {
        'word_emb': nrm((VOCAB, HIDDEN)),
        'pos_emb': nrm((MAX_POS, HIDDEN)),
        'type_emb': nrm((TYPE_VOCAB, HIDDEN)),
        'emb_ln_g': jnp.ones((1, HIDDEN), jnp.float32),
        'emb_ln_b': jnp.zeros((1, HIDDEN), jnp.float32),
    }

    wqkv, bqkv, wo, bo = [], [], [], []
    ln1g, ln1b, w1, b1, w2, b2, ln2g, ln2b = [], [], [], [], [], [], [], []
    for _ in range(N_LAYERS):
        wq, wk, wv = nrm((HIDDEN, HIDDEN)), nrm((HIDDEN, HIDDEN)), nrm((HIDDEN, HIDDEN))
        bq = jnp.zeros((1, HIDDEN), jnp.float32)
        bk = jnp.zeros((1, HIDDEN), jnp.float32)
        bv = jnp.zeros((1, HIDDEN), jnp.float32)
        # Fold 1/sqrt(head_dim) into the query projection (weights and bias).
        wqkv.append(jnp.concatenate([wq * inv_sqrt, wk, wv], axis=1))      # (H, 3H)
        bqkv.append(jnp.concatenate([bq * inv_sqrt, bk, bv], axis=1))      # (1, 3H)
        wo.append(nrm((HIDDEN, HIDDEN)))
        bo.append(jnp.zeros((1, HIDDEN), jnp.float32))
        ln1g.append(jnp.ones((1, HIDDEN), jnp.float32))
        ln1b.append(jnp.zeros((1, HIDDEN), jnp.float32))
        w1.append(nrm((HIDDEN, INTERMEDIATE)))
        b1.append(jnp.zeros((1, INTERMEDIATE), jnp.float32))
        w2.append(nrm((INTERMEDIATE, HIDDEN)))
        b2.append(jnp.zeros((1, HIDDEN), jnp.float32))
        ln2g.append(jnp.ones((1, HIDDEN), jnp.float32))
        ln2b.append(jnp.zeros((1, HIDDEN), jnp.float32))

    params.update(
        wqkv=jnp.stack(wqkv), bqkv=jnp.stack(bqkv),
        wo=jnp.stack(wo), bo=jnp.stack(bo),
        ln1_g=jnp.stack(ln1g), ln1_b=jnp.stack(ln1b),
        w1=jnp.stack(w1), b1=jnp.stack(b1),
        w2=jnp.stack(w2), b2=jnp.stack(b2),
        ln2_g=jnp.stack(ln2g), ln2_b=jnp.stack(ln2b),
    )

    # Classifier (Linear(H, CLS_HIDDEN) -> ReLU -> Linear(CLS_HIDDEN, N_LABEL)),
    # zero-padded to 128 output lanes for a lane-dense final store.
    cw1 = nrm((HIDDEN, CLS_HIDDEN))
    cw2 = nrm((CLS_HIDDEN, N_LABEL))
    params['cls_w1'] = jnp.zeros((HIDDEN, LANE), jnp.float32).at[:, :CLS_HIDDEN].set(cw1)
    params['cls_b1'] = jnp.zeros((1, LANE), jnp.float32)
    params['cls_w2'] = jnp.zeros((LANE, LANE), jnp.float32).at[:CLS_HIDDEN, :N_LABEL].set(cw2)
    params['cls_b2'] = jnp.zeros((1, LANE), jnp.float32)
    return params


# -------------------- forward (BertClassifier.forward) --------------------

@jax.jit
def bert_classifier_forward(params, input_ids, attention_mask):
    B, S = input_ids.shape

    # BERT embeddings: word + position + token_type (all type 0). Gather stays in plain-JAX glue.
    we = jnp.take(params['word_emb'], input_ids, axis=0)            # (B, S, H)
    pe = params['pos_emb'][:S][None, :, :]                          # (1, S, H)
    te = params['type_emb'][0][None, None, :]                       # (1, 1, H)
    emb = (we + pe + te).astype(jnp.float32)

    # Additive attention mask precomputed once (not per layer / per kernel).
    neg_mask = ((1.0 - attention_mask.astype(jnp.float32)) * jnp.float32(-1e9)).reshape(B, 1, S)

    def full(shape):
        return pl.BlockSpec(shape, lambda b, _s=shape: (0,) * len(_s))

    in_specs = [
        pl.BlockSpec((1, S, HIDDEN), lambda b: (b, 0, 0)),           # embeddings (per batch)
        pl.BlockSpec((1, 1, S), lambda b: (b, 0, 0)),                # additive mask (per batch)
        full((1, HIDDEN)), full((1, HIDDEN)),                        # emb LN gamma/beta
        full((N_LAYERS, HIDDEN, 3 * HIDDEN)), full((N_LAYERS, 1, 3 * HIDDEN)),   # wqkv / bqkv
        full((N_LAYERS, HIDDEN, HIDDEN)), full((N_LAYERS, 1, HIDDEN)),           # wo / bo
        full((N_LAYERS, 1, HIDDEN)), full((N_LAYERS, 1, HIDDEN)),                # ln1 g/b
        full((N_LAYERS, HIDDEN, INTERMEDIATE)), full((N_LAYERS, 1, INTERMEDIATE)),  # w1 / b1
        full((N_LAYERS, INTERMEDIATE, HIDDEN)), full((N_LAYERS, 1, HIDDEN)),        # w2 / b2
        full((N_LAYERS, 1, HIDDEN)), full((N_LAYERS, 1, HIDDEN)),                # ln2 g/b
        full((HIDDEN, LANE)), full((1, LANE)),                       # classifier w1 / b1 (padded)
        full((LANE, LANE)), full((1, LANE)),                         # classifier w2 / b2 (padded)
    ]
    out_spec = pl.BlockSpec((1, 1, LANE), lambda b: (b, 0, 0))

    out = pl.pallas_call(
        fused_bert_kernel,
        out_shape=jax.ShapeDtypeStruct((B, 1, LANE), jnp.float32),
        grid=(B,),                                                   # batch axis -> 2 TCs on v7x
        in_specs=in_specs,
        out_specs=out_spec,
        compiler_params=pltpu.CompilerParams(
            dimension_semantics=("parallel",),
        ),
    )(emb, neg_mask,
      params['emb_ln_g'], params['emb_ln_b'],
      params['wqkv'], params['bqkv'], params['wo'], params['bo'],
      params['ln1_g'], params['ln1_b'],
      params['w1'], params['b1'], params['w2'], params['b2'],
      params['ln2_g'], params['ln2_b'],
      params['cls_w1'], params['cls_b1'], params['cls_w2'], params['cls_b2'])

    # bert_outputs[0][:, 0, :] -> classifier; slice padded lanes back to N_LABEL logits.
    return out[:, 0, :N_LABEL]


if __name__ == "__main__":
    key = jax.random.PRNGKey(0)
    pkey, ikey = jax.random.split(key)
    params = init_params(pkey)

    input_ids = jax.random.randint(ikey, (BATCH, SEQ), 0, VOCAB, dtype=jnp.int32)
    attention_mask = jnp.array([[1, 1, 1, 1, 1, 1, 0, 0],
                                [1, 1, 1, 1, 1, 0, 0, 0]], dtype=jnp.int32)

    logits = bert_classifier_forward(params, input_ids, attention_mask)
    logits = jax.block_until_ready(logits)
    assert logits.shape == (BATCH, N_LABEL)
    assert bool(jnp.all(jnp.isfinite(logits)))
    print("KERNEL_OK")
</pallas_src>

<mosaic_0001>
module attributes {stable_mosaic.version = 11 : i64} {
  func.func @fused_bert_kernel(%arg0: i32, %arg1: memref<1x8x32xf32, #tpu.memory_space<vmem>>, %arg2: memref<1x1x8xf32, #tpu.memory_space<vmem>>, %arg3: memref<1x32xf32, #tpu.memory_space<vmem>>, %arg4: memref<1x32xf32, #tpu.memory_space<vmem>>, %arg5: memref<2x32x96xf32, #tpu.memory_space<vmem>>, %arg6: memref<2x1x96xf32, #tpu.memory_space<vmem>>, %arg7: memref<2x32x32xf32, #tpu.memory_space<vmem>>, %arg8: memref<2x1x32xf32, #tpu.memory_space<vmem>>, %arg9: memref<2x1x32xf32, #tpu.memory_space<vmem>>, %arg10: memref<2x1x32xf32, #tpu.memory_space<vmem>>, %arg11: memref<2x32x64xf32, #tpu.memory_space<vmem>>, %arg12: memref<2x1x64xf32, #tpu.memory_space<vmem>>, %arg13: memref<2x64x32xf32, #tpu.memory_space<vmem>>, %arg14: memref<2x1x32xf32, #tpu.memory_space<vmem>>, %arg15: memref<2x1x32xf32, #tpu.memory_space<vmem>>, %arg16: memref<2x1x32xf32, #tpu.memory_space<vmem>>, %arg17: memref<32x128xf32, #tpu.memory_space<vmem>>, %arg18: memref<1x128xf32, #tpu.memory_space<vmem>>, %arg19: memref<128x128xf32, #tpu.memory_space<vmem>>, %arg20: memref<1x128xf32, #tpu.memory_space<vmem>>, %arg21: memref<1x1x128xf32, #tpu.memory_space<vmem>>) attributes {dimension_semantics = [#tpu.dimension_semantics<parallel>], iteration_bounds = array<i64: 2>, scalar_prefetch = 0 : i64, scratch_operands = 0 : i64, tpu.core_type = #tpu.core_type<tc>, window_params = [{transform_indices = @transform_0, window_bounds = array<i64: 1, 8, 32>}, {transform_indices = @transform_1, window_bounds = array<i64: 1, 1, 8>}, {pipeline_mode = #tpu.pipeline_mode<synchronous>, transform_indices = @transform_2, window_bounds = array<i64: 1, 32>}, {pipeline_mode = #tpu.pipeline_mode<synchronous>, transform_indices = @transform_3, window_bounds = array<i64: 1, 32>}, {pipeline_mode = #tpu.pipeline_mode<synchronous>, transform_indices = @transform_4, window_bounds = array<i64: 2, 32, 96>}, {pipeline_mode = #tpu.pipeline_mode<synchronous>, transform_indices = @transform_5, window_bounds = array<i64: 2, 1, 96>}, {pipeline_mode = #tpu.pipeline_mode<synchronous>, transform_indices = @transform_6, window_bounds = array<i64: 2, 32, 32>}, {pipeline_mode = #tpu.pipeline_mode<synchronous>, transform_indices = @transform_7, window_bounds = array<i64: 2, 1, 32>}, {pipeline_mode = #tpu.pipeline_mode<synchronous>, transform_indices = @transform_8, window_bounds = array<i64: 2, 1, 32>}, {pipeline_mode = #tpu.pipeline_mode<synchronous>, transform_indices = @transform_9, window_bounds = array<i64: 2, 1, 32>}, {pipeline_mode = #tpu.pipeline_mode<synchronous>, transform_indices = @transform_10, window_bounds = array<i64: 2, 32, 64>}, {pipeline_mode = #tpu.pipeline_mode<synchronous>, transform_indices = @transform_11, window_bounds = array<i64: 2, 1, 64>}, {pipeline_mode = #tpu.pipeline_mode<synchronous>, transform_indices = @transform_12, window_bounds = array<i64: 2, 64, 32>}, {pipeline_mode = #tpu.pipeline_mode<synchronous>, transform_indices = @transform_13, window_bounds = array<i64: 2, 1, 32>}, {pipeline_mode = #tpu.pipeline_mode<synchronous>, transform_indices = @transform_14, window_bounds = array<i64: 2, 1, 32>}, {pipeline_mode = #tpu.pipeline_mode<synchronous>, transform_indices = @transform_15, window_bounds = array<i64: 2, 1, 32>}, {pipeline_mode = #tpu.pipeline_mode<synchronous>, transform_indices = @transform_16, window_bounds = array<i64: 32, 128>}, {pipeline_mode = #tpu.pipeline_mode<synchronous>, transform_indices = @transform_17, window_bounds = array<i64: 1, 128>}, {pipeline_mode = #tpu.pipeline_mode<synchronous>, transform_indices = @transform_18, window_bounds = array<i64: 128, 128>}, {pipeline_mode = #tpu.pipeline_mode<synchronous>, transform_indices = @transform_19, window_bounds = array<i64: 1, 128>}, {transform_indices = @transform_20, window_bounds = array<i64: 1, 1, 128>}]} {
    %c0 = arith.constant 0 : index
    %c0_0 = arith.constant 0 : index
    %c0_1 = arith.constant 0 : index
    %0 = vector.load %arg1[%c0, %c0_0, %c0_1] : memref<1x8x32xf32, #tpu.memory_space<vmem>>, vector<1x8x32xf32>
    %1 = vector.shape_cast %0 : vector<1x8x32xf32> to vector<8x32xf32>
    %c0_2 = arith.constant 0 : index
    %c0_3 = arith.constant 0 : index
    %2 = vector.load %arg3[%c0_2, %c0_3] : memref<1x32xf32, #tpu.memory_space<vmem>>, vector<1x32xf32>
    %c0_4 = arith.constant 0 : index
    %c0_5 = arith.constant 0 : index
    %3 = vector.load %arg4[%c0_4, %c0_5] : memref<1x32xf32, #tpu.memory_space<vmem>>, vector<1x32xf32>
    %cst = arith.constant dense<0.000000e+00> : vector<8xf32>
    %4 = vector.multi_reduction <add>, %1, %cst [1] : vector<8x32xf32> to vector<8xf32>
    %5 = vector.shape_cast %4 : vector<8xf32> to vector<8x1xf32>
    %cst_6 = arith.constant 3.200000e+01 : f32
    %6 = vector.broadcast %cst_6 : f32 to vector<8x1xf32>
    %7 = arith.divf %5, %6 : vector<8x1xf32>
    %8 = vector.broadcast %7 : vector<8x1xf32> to vector<8x32xf32>
    %9 = arith.subf %1, %8 : vector<8x32xf32>
    %10 = arith.mulf %9, %9 : vector<8x32xf32>
    %cst_7 = arith.constant dense<0.000000e+00> : vector<8xf32>
    %11 = vector.multi_reduction <add>, %10, %cst_7 [1] : vector<8x32xf32> to vector<8xf32>
    %12 = vector.shape_cast %11 : vector<8xf32> to vector<8x1xf32>
    %cst_8 = arith.constant 3.200000e+01 : f32
    %13 = vector.broadcast %cst_8 : f32 to vector<8x1xf32>
    %14 = arith.divf %12, %13 : vector<8x1xf32>
    %15 = vector.broadcast %7 : vector<8x1xf32> to vector<8x32xf32>
    %16 = arith.subf %1, %15 : vector<8x32xf32>
    %cst_9 = arith.constant 9.99999996E-13 : f32
    %17 = vector.broadcast %cst_9 : f32 to vector<8x1xf32>
    %18 = arith.addf %14, %17 : vector<8x1xf32>
    %19 = math.rsqrt %18 : vector<8x1xf32>
    %20 = vector.broadcast %19 : vector<8x1xf32> to vector<8x32xf32>
    %21 = arith.mulf %16, %20 : vector<8x32xf32>
    %22 = vector.broadcast %2 : vector<1x32xf32> to vector<8x32xf32>
    %23 = arith.mulf %21, %22 : vector<8x32xf32>
    %24 = vector.broadcast %3 : vector<1x32xf32> to vector<8x32xf32>
    %25 = arith.addf %23, %24 : vector<8x32xf32>
    %c0_10 = arith.constant 0 : index
    %c0_11 = arith.constant 0 : index
    %c0_12 = arith.constant 0 : index
    %26 = vector.load %arg2[%c0_10, %c0_11, %c0_12] : memref<1x1x8xf32, #tpu.memory_space<vmem>>, vector<1x1x8xf32>
    %27 = vector.shape_cast %26 : vector<1x1x8xf32> to vector<1x8xf32>
    %c0_13 = arith.constant 0 : index
    %c0_14 = arith.constant 0 : index
    %c0_15 = arith.constant 0 : index
    %28 = vector.load %arg5[%c0_13, %c0_14, %c0_15] : memref<2x32x96xf32, #tpu.memory_space<vmem>>, vector<1x32x96xf32>
    %29 = vector.shape_cast %28 : vector<1x32x96xf32> to vector<32x96xf32>
    %cst_16 = arith.constant dense<0.000000e+00> : vector<8x96xf32>
    %30 = tpu.matmul %25, %29, %cst_16 {dimension_numbers = #tpu.dot_dimension_numbers<[1], [0], [0], [1], [0, 0, 1, 1], [], []>} : vector<8x32xf32>, vector<32x96xf32>, vector<8x96xf32> -> vector<8x96xf32>
    %c0_17 = arith.constant 0 : index
    %c0_18 = arith.constant 0 : index
    %c0_19 = arith.constant 0 : index
    %31 = vector.load %arg6[%c0_17, %c0_18, %c0_19] : memref<2x1x96xf32, #tpu.memory_space<vmem>>, vector<1x1x96xf32>
    %32 = vector.shape_cast %31 : vector<1x1x96xf32> to vector<1x96xf32>
    %33 = vector.broadcast %32 : vector<1x96xf32> to vector<8x96xf32>
    %34 = arith.addf %30, %33 : vector<8x96xf32>
    %35 = vector.extract_strided_slice %34 {offsets = [0, 0], sizes = [8, 32], strides = [1, 1]} : vector<8x96xf32> to vector<8x32xf32>
    %36 = vector.shape_cast %35 : vector<8x32xf32> to vector<8x4x8xf32>
    %37 = tpu.transpose %36, [1, 0, 2] : vector<8x4x8xf32> -> vector<4x8x8xf32>
    %38 = vector.extract_strided_slice %34 {offsets = [0, 32], sizes = [8, 32], strides = [1, 1]} : vector<8x96xf32> to vector<8x32xf32>
    %39 = vector.shape_cast %38 : vector<8x32xf32> to vector<8x4x8xf32>
    %40 = tpu.transpose %39, [1, 0, 2] : vector<8x4x8xf32> -> vector<4x8x8xf32>
    %41 = vector.extract_strided_slice %34 {offsets = [0, 64], sizes = [8, 32], strides = [1, 1]} : vector<8x96xf32> to vector<8x32xf32>
    %42 = vector.shape_cast %41 : vector<8x32xf32> to vector<8x4x8xf32>
    %43 = tpu.transpose %42, [1, 0, 2] : vector<8x4x8xf32> -> vector<4x8x8xf32>
    "tpu.trace_start"() <{level = 10 : i32, message = "nqd,nkd->nqk"}> : () -> ()
    %cst_20 = arith.constant dense<0.000000e+00> : vector<4x8x8xf32>
    %44 = tpu.matmul %37, %40, %cst_20 {dimension_numbers = #tpu.dot_dimension_numbers<[2], [2], [1], [1], [0, 0, 0, 1, 1, 1], [0], [0]>} : vector<4x8x8xf32>, vector<4x8x8xf32>, vector<4x8x8xf32> -> vector<4x8x8xf32>
    "tpu.trace_stop"() : () -> ()
    %45 = vector.shape_cast %27 : vector<1x8xf32> to vector<1x1x8xf32>
    %46 = vector.broadcast %45 : vector<1x1x8xf32> to vector<4x8x8xf32>
    %47 = arith.addf %44, %46 : vector<4x8x8xf32>
    %cst_21 = arith.constant dense<0xFF800000> : vector<4x8xf32>
    %48 = vector.multi_reduction <maximumf>, %47, %cst_21 [2] : vector<4x8x8xf32> to vector<4x8xf32>
    %49 = vector.shape_cast %48 : vector<4x8xf32> to vector<4x8x1xf32>
    %50 = vector.broadcast %49 : vector<4x8x1xf32> to vector<4x8x8xf32>
    %51 = arith.subf %47, %50 : vector<4x8x8xf32>
    %52 = math.exp %51 : vector<4x8x8xf32>
    %cst_22 = arith.constant dense<0.000000e+00> : vector<4x8xf32>
    %53 = vector.multi_reduction <add>, %52, %cst_22 [2] : vector<4x8x8xf32> to vector<4x8xf32>
    %54 = vector.shape_cast %53 : vector<4x8xf32> to vector<4x8x1xf32>
    %55 = tpu.reciprocal %54 {approx = true} : vector<4x8x1xf32> -> vector<4x8x1xf32>
    %56 = vector.broadcast %55 : vector<4x8x1xf32> to vector<4x8x8xf32>
    %57 = arith.mulf %52, %56 : vector<4x8x8xf32>
    "tpu.trace_start"() <{level = 10 : i32, message = "nqk,nkd->nqd"}> : () -> ()
    %cst_23 = arith.constant dense<0.000000e+00> : vector<4x8x8xf32>
    %58 = tpu.matmul %57, %43, %cst_23 {dimension_numbers = #tpu.dot_dimension_numbers<[2], [1], [1], [2], [0, 0, 0, 1, 1, 2], [0], [0]>} : vector<4x8x8xf32>, vector<4x8x8xf32>, vector<4x8x8xf32> -> vector<4x8x8xf32>
    "tpu.trace_stop"() : () -> ()
    %59 = tpu.transpose %58, [1, 0, 2] : vector<4x8x8xf32> -> vector<8x4x8xf32>
    %60 = vector.shape_cast %59 : vector<8x4x8xf32> to vector<8x32xf32>
    %c0_24 = arith.constant 0 : index
    %c0_25 = arith.constant 0 : index
    %c0_26 = arith.constant 0 : index
    %61 = vector.load %arg7[%c0_24, %c0_25, %c0_26] : memref<2x32x32xf32, #tpu.memory_space<vmem>>, vector<1x32x32xf32>
    %62 = vector.shape_cast %61 : vector<1x32x32xf32> to vector<32x32xf32>
    %cst_27 = arith.constant dense<0.000000e+00> : vector<8x32xf32>
    %63 = tpu.matmul %60, %62, %cst_27 {dimension_numbers = #tpu.dot_dimension_numbers<[1], [0], [0], [1], [0, 0, 1, 1], [], []>} : vector<8x32xf32>, vector<32x32xf32>, vector<8x32xf32> -> vector<8x32xf32>
    %c0_28 = arith.constant 0 : index
    %c0_29 = arith.constant 0 : index
    %c0_30 = arith.constant 0 : index
    %64 = vector.load %arg8[%c0_28, %c0_29, %c0_30] : memref<2x1x32xf32, #tpu.memory_space<vmem>>, vector<1x1x32xf32>
    %65 = vector.shape_cast %64 : vector<1x1x32xf32> to vector<1x32xf32>
    %66 = vector.broadcast %65 : vector<1x32xf32> to vector<8x32xf32>
    %67 = arith.addf %63, %66 : vector<8x32xf32>
    %68 = arith.addf %25, %67 : vector<8x32xf32>
    %c0_31 = arith.constant 0 : index
    %c0_32 = arith.constant 0 : index
    %c0_33 = arith.constant 0 : index
    %69 = vector.load %arg9[%c0_31, %c0_32, %c0_33] : memref<2x1x32xf32, #tpu.memory_space<vmem>>, vector<1x1x32xf32>
    %70 = vector.shape_cast %69 : vector<1x1x32xf32> to vector<1x32xf32>
    %c0_34 = arith.constant 0 : index
    %c0_35 = arith.constant 0 : index
    %c0_36 = arith.constant 0 : index
    %71 = vector.load %arg10[%c0_34, %c0_35, %c0_36] : memref<2x1x32xf32, #tpu.memory_space<vmem>>, vector<1x1x32xf32>
    %72 = vector.shape_cast %71 : vector<1x1x32xf32> to vector<1x32xf32>
    %cst_37 = arith.constant dense<0.000000e+00> : vector<8xf32>
    %73 = vector.multi_reduction <add>, %68, %cst_37 [1] : vector<8x32xf32> to vector<8xf32>
    %74 = vector.shape_cast %73 : vector<8xf32> to vector<8x1xf32>
    %cst_38 = arith.constant 3.200000e+01 : f32
    %75 = vector.broadcast %cst_38 : f32 to vector<8x1xf32>
    %76 = arith.divf %74, %75 : vector<8x1xf32>
    %77 = vector.broadcast %76 : vector<8x1xf32> to vector<8x32xf32>
    %78 = arith.subf %68, %77 : vector<8x32xf32>
    %79 = arith.mulf %78, %78 : vector<8x32xf32>
    %cst_39 = arith.constant dense<0.000000e+00> : vector<8xf32>
    %80 = vector.multi_reduction <add>, %79, %cst_39 [1] : vector<8x32xf32> to vector<8xf32>
    %81 = vector.shape_cast %80 : vector<8xf32> to vector<8x1xf32>
    %cst_40 = arith.constant 3.200000e+01 : f32
    %82 = vector.broadcast %cst_40 : f32 to vector<8x1xf32>
    %83 = arith.divf %81, %82 : vector<8x1xf32>
    %84 = vector.broadcast %76 : vector<8x1xf32> to vector<8x32xf32>
    %85 = arith.subf %68, %84 : vector<8x32xf32>
    %cst_41 = arith.constant 9.99999996E-13 : f32
    %86 = vector.broadcast %cst_41 : f32 to vector<8x1xf32>
    %87 = arith.addf %83, %86 : vector<8x1xf32>
    %88 = math.rsqrt %87 : vector<8x1xf32>
    %89 = vector.broadcast %88 : vector<8x1xf32> to vector<8x32xf32>
    %90 = arith.mulf %85, %89 : vector<8x32xf32>
    %91 = vector.broadcast %70 : vector<1x32xf32> to vector<8x32xf32>
    %92 = arith.mulf %90, %91 : vector<8x32xf32>
    %93 = vector.broadcast %72 : vector<1x32xf32> to vector<8x32xf32>
    %94 = arith.addf %92, %93 : vector<8x32xf32>
    %c0_42 = arith.constant 0 : index
    %c0_43 = arith.constant 0 : index
    %c0_44 = arith.constant 0 : index
    %95 = vector.load %arg11[%c0_42, %c0_43, %c0_44] : memref<2x32x64xf32, #tpu.memory_space<vmem>>, vector<1x32x64xf32>
    %96 = vector.shape_cast %95 : vector<1x32x64xf32> to vector<32x64xf32>
    %cst_45 = arith.constant dense<0.000000e+00> : vector<8x64xf32>
    %97 = tpu.matmul %94, %96, %cst_45 {dimension_numbers = #tpu.dot_dimension_numbers<[1], [0], [0], [1], [0, 0, 1, 1], [], []>} : vector<8x32xf32>, vector<32x64xf32>, vector<8x64xf32> -> vector<8x64xf32>
    %c0_46 = arith.constant 0 : index
    %c0_47 = arith.constant 0 : index
    %c0_48 = arith.constant 0 : index
    %98 = vector.load %arg12[%c0_46, %c0_47, %c0_48] : memref<2x1x64xf32, #tpu.memory_space<vmem>>, vector<1x1x64xf32>
    %99 = vector.shape_cast %98 : vector<1x1x64xf32> to vector<1x64xf32>
    %100 = vector.broadcast %99 : vector<1x64xf32> to vector<8x64xf32>
    %101 = arith.addf %97, %100 : vector<8x64xf32>
    %cst_49 = arith.constant 5.000000e-01 : f32
    %102 = vector.broadcast %cst_49 : f32 to vector<8x64xf32>
    %103 = arith.mulf %102, %101 : vector<8x64xf32>
    %cst_50 = arith.constant 4.471500e-02 : f32
    %104 = vector.broadcast %cst_50 : f32 to vector<8x64xf32>
    %105 = arith.mulf %104, %101 : vector<8x64xf32>
    %106 = arith.mulf %105, %101 : vector<8x64xf32>
    %107 = arith.mulf %106, %101 : vector<8x64xf32>
    %108 = arith.addf %101, %107 : vector<8x64xf32>
    %cst_51 = arith.constant 0.797884583 : f32
    %109 = vector.broadcast %cst_51 : f32 to vector<8x64xf32>
    %110 = arith.mulf %109, %108 : vector<8x64xf32>
    %111 = math.tanh %110 : vector<8x64xf32>
    %cst_52 = arith.constant 1.000000e+00 : f32
    %112 = vector.broadcast %cst_52 : f32 to vector<8x64xf32>
    %113 = arith.addf %112, %111 : vector<8x64xf32>
    %114 = arith.mulf %103, %113 : vector<8x64xf32>
    %c0_53 = arith.constant 0 : index
    %c0_54 = arith.constant 0 : index
    %c0_55 = arith.constant 0 : index
    %115 = vector.load %arg13[%c0_53, %c0_54, %c0_55] : memref<2x64x32xf32, #tpu.memory_space<vmem>>, vector<1x64x32xf32>
    %116 = vector.shape_cast %115 : vector<1x64x32xf32> to vector<64x32xf32>
    %cst_56 = arith.constant dense<0.000000e+00> : vector<8x32xf32>
    %117 = tpu.matmul %114, %116, %cst_56 {dimension_numbers = #tpu.dot_dimension_numbers<[1], [0], [0], [1], [0, 0, 1, 1], [], []>} : vector<8x64xf32>, vector<64x32xf32>, vector<8x32xf32> -> vector<8x32xf32>
    %c0_57 = arith.constant 0 : index
    %c0_58 = arith.constant 0 : index
    %c0_59 = arith.constant 0 : index
    %118 = vector.load %arg14[%c0_57, %c0_58, %c0_59] : memref<2x1x32xf32, #tpu.memory_space<vmem>>, vector<1x1x32xf32>
    %119 = vector.shape_cast %118 : vector<1x1x32xf32> to vector<1x32xf32>
    %120 = vector.broadcast %119 : vector<1x32xf32> to vector<8x32xf32>
    %121 = arith.addf %117, %120 : vector<8x32xf32>
    %122 = arith.addf %94, %121 : vector<8x32xf32>
    %c0_60 = arith.constant 0 : index
    %c0_61 = arith.constant 0 : index
    %c0_62 = arith.constant 0 : index
    %123 = vector.load %arg15[%c0_60, %c0_61, %c0_62] : memref<2x1x32xf32, #tpu.memory_space<vmem>>, vector<1x1x32xf32>
    %124 = vector.shape_cast %123 : vector<1x1x32xf32> to vector<1x32xf32>
    %c0_63 = arith.constant 0 : index
    %c0_64 = arith.constant 0 : index
    %c0_65 = arith.constant 0 : index
    %125 = vector.load %arg16[%c0_63, %c0_64, %c0_65] : memref<2x1x32xf32, #tpu.memory_space<vmem>>, vector<1x1x32xf32>
    %126 = vector.shape_cast %125 : vector<1x1x32xf32> to vector<1x32xf32>
    %cst_66 = arith.constant dense<0.000000e+00> : vector<8xf32>
    %127 = vector.multi_reduction <add>, %122, %cst_66 [1] : vector<8x32xf32> to vector<8xf32>
    %128 = vector.shape_cast %127 : vector<8xf32> to vector<8x1xf32>
    %cst_67 = arith.constant 3.200000e+01 : f32
    %129 = vector.broadcast %cst_67 : f32 to vector<8x1xf32>
    %130 = arith.divf %128, %129 : vector<8x1xf32>
    %131 = vector.broadcast %130 : vector<8x1xf32> to vector<8x32xf32>
    %132 = arith.subf %122, %131 : vector<8x32xf32>
    %133 = arith.mulf %132, %132 : vector<8x32xf32>
    %cst_68 = arith.constant dense<0.000000e+00> : vector<8xf32>
    %134 = vector.multi_reduction <add>, %133, %cst_68 [1] : vector<8x32xf32> to vector<8xf32>
    %135 = vector.shape_cast %134 : vector<8xf32> to vector<8x1xf32>
    %cst_69 = arith.constant 3.200000e+01 : f32
    %136 = vector.broadcast %cst_69 : f32 to vector<8x1xf32>
    %137 = arith.divf %135, %136 : vector<8x1xf32>
    %138 = vector.broadcast %130 : vector<8x1xf32> to vector<8x32xf32>
    %139 = arith.subf %122, %138 : vector<8x32xf32>
    %cst_70 = arith.constant 9.99999996E-13 : f32
    %140 = vector.broadcast %cst_70 : f32 to vector<8x1xf32>
    %141 = arith.addf %137, %140 : vector<8x1xf32>
    %142 = math.rsqrt %141 : vector<8x1xf32>
    %143 = vector.broadcast %142 : vector<8x1xf32> to vector<8x32xf32>
    %144 = arith.mulf %139, %143 : vector<8x32xf32>
    %145 = vector.broadcast %124 : vector<1x32xf32> to vector<8x32xf32>
    %146 = arith.mulf %144, %145 : vector<8x32xf32>
    %147 = vector.broadcast %126 : vector<1x32xf32> to vector<8x32xf32>
    %148 = arith.addf %146, %147 : vector<8x32xf32>
    %c1 = arith.constant 1 : index
    %c0_71 = arith.constant 0 : index
    %c0_72 = arith.constant 0 : index
    %149 = vector.load %arg5[%c1, %c0_71, %c0_72] : memref<2x32x96xf32, #tpu.memory_space<vmem>>, vector<1x32x96xf32>
    %150 = vector.shape_cast %149 : vector<1x32x96xf32> to vector<32x96xf32>
    %cst_73 = arith.constant dense<0.000000e+00> : vector<8x96xf32>
    %151 = tpu.matmul %148, %150, %cst_73 {dimension_numbers = #tpu.dot_dimension_numbers<[1], [0], [0], [1], [0, 0, 1, 1], [], []>} : vector<8x32xf32>, vector<32x96xf32>, vector<8x96xf32> -> vector<8x96xf32>
    %c1_74 = arith.constant 1 : index
    %c0_75 = arith.constant 0 : index
    %c0_76 = arith.constant 0 : index
    %152 = vector.load %arg6[%c1_74, %c0_75, %c0_76] : memref<2x1x96xf32, #tpu.memory_space<vmem>>, vector<1x1x96xf32>
    %153 = vector.shape_cast %152 : vector<1x1x96xf32> to vector<1x96xf32>
    %154 = vector.broadcast %153 : vector<1x96xf32> to vector<8x96xf32>
    %155 = arith.addf %151, %154 : vector<8x96xf32>
    %156 = vector.extract_strided_slice %155 {offsets = [0, 0], sizes = [8, 32], strides = [1, 1]} : vector<8x96xf32> to vector<8x32xf32>
    %157 = vector.shape_cast %156 : vector<8x32xf32> to vector<8x4x8xf32>
    %158 = tpu.transpose %157, [1, 0, 2] : vector<8x4x8xf32> -> vector<4x8x8xf32>
    %159 = vector.extract_strided_slice %155 {offsets = [0, 32], sizes = [8, 32], strides = [1, 1]} : vector<8x96xf32> to vector<8x32xf32>
    %160 = vector.shape_cast %159 : vector<8x32xf32> to vector<8x4x8xf32>
    %161 = tpu.transpose %160, [1, 0, 2] : vector<8x4x8xf32> -> vector<4x8x8xf32>
    %162 = vector.extract_strided_slice %155 {offsets = [0, 64], sizes = [8, 32], strides = [1, 1]} : vector<8x96xf32> to vector<8x32xf32>
    %163 = vector.shape_cast %162 : vector<8x32xf32> to vector<8x4x8xf32>
    %164 = tpu.transpose %163, [1, 0, 2] : vector<8x4x8xf32> -> vector<4x8x8xf32>
    "tpu.trace_start"() <{level = 10 : i32, message = "nqd,nkd->nqk"}> : () -> ()
    %cst_77 = arith.constant dense<0.000000e+00> : vector<4x8x8xf32>
    %165 = tpu.matmul %158, %161, %cst_77 {dimension_numbers = #tpu.dot_dimension_numbers<[2], [2], [1], [1], [0, 0, 0, 1, 1, 1], [0], [0]>} : vector<4x8x8xf32>, vector<4x8x8xf32>, vector<4x8x8xf32> -> vector<4x8x8xf32>
    "tpu.trace_stop"() : () -> ()
    %166 = vector.shape_cast %27 : vector<1x8xf32> to vector<1x1x8xf32>
    %167 = vector.broadcast %166 : vector<1x1x8xf32> to vector<4x8x8xf32>
    %168 = arith.addf %165, %167 : vector<4x8x8xf32>
    %cst_78 = arith.constant dense<0xFF800000> : vector<4x8xf32>
    %169 = vector.multi_reduction <maximumf>, %168, %cst_78 [2] : vector<4x8x8xf32> to vector<4x8xf32>
    %170 = vector.shape_cast %169 : vector<4x8xf32> to vector<4x8x1xf32>
    %171 = vector.broadcast %170 : vector<4x8x1xf32> to vector<4x8x8xf32>
    %172 = arith.subf %168, %171 : vector<4x8x8xf32>
    %173 = math.exp %172 : vector<4x8x8xf32>
    %cst_79 = arith.constant dense<0.000000e+00> : vector<4x8xf32>
    %174 = vector.multi_reduction <add>, %173, %cst_79 [2] : vector<4x8x8xf32> to vector<4x8xf32>
    %175 = vector.shape_cast %174 : vector<4x8xf32> to vector<4x8x1xf32>
    %176 = tpu.reciprocal %175 {approx = true} : vector<4x8x1xf32> -> vector<4x8x1xf32>
    %177 = vector.broadcast %176 : vector<4x8x1xf32> to vector<4x8x8xf32>
    %178 = arith.mulf %173, %177 : vector<4x8x8xf32>
    "tpu.trace_start"() <{level = 10 : i32, message = "nqk,nkd->nqd"}> : () -> ()
    %cst_80 = arith.constant dense<0.000000e+00> : vector<4x8x8xf32>
    %179 = tpu.matmul %178, %164, %cst_80 {dimension_numbers = #tpu.dot_dimension_numbers<[2], [1], [1], [2], [0, 0, 0, 1, 1, 2], [0], [0]>} : vector<4x8x8xf32>, vector<4x8x8xf32>, vector<4x8x8xf32> -> vector<4x8x8xf32>
    "tpu.trace_stop"() : () -> ()
    %180 = tpu.transpose %179, [1, 0, 2] : vector<4x8x8xf32> -> vector<8x4x8xf32>
    %181 = vector.shape_cast %180 : vector<8x4x8xf32> to vector<8x32xf32>
    %c1_81 = arith.constant 1 : index
    %c0_82 = arith.constant 0 : index
    %c0_83 = arith.constant 0 : index
    %182 = vector.load %arg7[%c1_81, %c0_82, %c0_83] : memref<2x32x32xf32, #tpu.memory_space<vmem>>, vector<1x32x32xf32>
    %183 = vector.shape_cast %182 : vector<1x32x32xf32> to vector<32x32xf32>
    %cst_84 = arith.constant dense<0.000000e+00> : vector<8x32xf32>
    %184 = tpu.matmul %181, %183, %cst_84 {dimension_numbers = #tpu.dot_dimension_numbers<[1], [0], [0], [1], [0, 0, 1, 1], [], []>} : vector<8x32xf32>, vector<32x32xf32>, vector<8x32xf32> -> vector<8x32xf32>
    %c1_85 = arith.constant 1 : index
    %c0_86 = arith.constant 0 : index
    %c0_87 = arith.constant 0 : index
    %185 = vector.load %arg8[%c1_85, %c0_86, %c0_87] : memref<2x1x32xf32, #tpu.memory_space<vmem>>, vector<1x1x32xf32>
    %186 = vector.shape_cast %185 : vector<1x1x32xf32> to vector<1x32xf32>
    %187 = vector.broadcast %186 : vector<1x32xf32> to vector<8x32xf32>
    %188 = arith.addf %184, %187 : vector<8x32xf32>
    %189 = arith.addf %148, %188 : vector<8x32xf32>
    %c1_88 = arith.constant 1 : index
    %c0_89 = arith.constant 0 : index
    %c0_90 = arith.constant 0 : index
    %190 = vector.load %arg9[%c1_88, %c0_89, %c0_90] : memref<2x1x32xf32, #tpu.memory_space<vmem>>, vector<1x1x32xf32>
    %191 = vector.shape_cast %190 : vector<1x1x32xf32> to vector<1x32xf32>
    %c1_91 = arith.constant 1 : index
    %c0_92 = arith.constant 0 : index
    %c0_93 = arith.constant 0 : index
    %192 = vector.load %arg10[%c1_91, %c0_92, %c0_93] : memref<2x1x32xf32, #tpu.memory_space<vmem>>, vector<1x1x32xf32>
    %193 = vector.shape_cast %192 : vector<1x1x32xf32> to vector<1x32xf32>
    %cst_94 = arith.constant dense<0.000000e+00> : vector<8xf32>
    %194 = vector.multi_reduction <add>, %189, %cst_94 [1] : vector<8x32xf32> to vector<8xf32>
    %195 = vector.shape_cast %194 : vector<8xf32> to vector<8x1xf32>
    %cst_95 = arith.constant 3.200000e+01 : f32
    %196 = vector.broadcast %cst_95 : f32 to vector<8x1xf32>
    %197 = arith.divf %195, %196 : vector<8x1xf32>
    %198 = vector.broadcast %197 : vector<8x1xf32> to vector<8x32xf32>
    %199 = arith.subf %189, %198 : vector<8x32xf32>
    %200 = arith.mulf %199, %199 : vector<8x32xf32>
    %cst_96 = arith.constant dense<0.000000e+00> : vector<8xf32>
    %201 = vector.multi_reduction <add>, %200, %cst_96 [1] : vector<8x32xf32> to vector<8xf32>
    %202 = vector.shape_cast %201 : vector<8xf32> to vector<8x1xf32>
    %cst_97 = arith.constant 3.200000e+01 : f32
    %203 = vector.broadcast %cst_97 : f32 to vector<8x1xf32>
    %204 = arith.divf %202, %203 : vector<8x1xf32>
    %205 = vector.broadcast %197 : vector<8x1xf32> to vector<8x32xf32>
    %206 = arith.subf %189, %205 : vector<8x32xf32>
    %cst_98 = arith.constant 9.99999996E-13 : f32
    %207 = vector.broadcast %cst_98 : f32 to vector<8x1xf32>
    %208 = arith.addf %204, %207 : vector<8x1xf32>
    %209 = math.rsqrt %208 : vector<8x1xf32>
    %210 = vector.broadcast %209 : vector<8x1xf32> to vector<8x32xf32>
    %211 = arith.mulf %206, %210 : vector<8x32xf32>
    %212 = vector.broadcast %191 : vector<1x32xf32> to vector<8x32xf32>
    %213 = arith.mulf %211, %212 : vector<8x32xf32>
    %214 = vector.broadcast %193 : vector<1x32xf32> to vector<8x32xf32>
    %215 = arith.addf %213, %214 : vector<8x32xf32>
    %c1_99 = arith.constant 1 : index
    %c0_100 = arith.constant 0 : index
    %c0_101 = arith.constant 0 : index
    %216 = vector.load %arg11[%c1_99, %c0_100, %c0_101] : memref<2x32x64xf32, #tpu.memory_space<vmem>>, vector<1x32x64xf32>
    %217 = vector.shape_cast %216 : vector<1x32x64xf32> to vector<32x64xf32>
    %cst_102 = arith.constant dense<0.000000e+00> : vector<8x64xf32>
    %218 = tpu.matmul %215, %217, %cst_102 {dimension_numbers = #tpu.dot_dimension_numbers<[1], [0], [0], [1], [0, 0, 1, 1], [], []>} : vector<8x32xf32>, vector<32x64xf32>, vector<8x64xf32> -> vector<8x64xf32>
    %c1_103 = arith.constant 1 : index
    %c0_104 = arith.constant 0 : index
    %c0_105 = arith.constant 0 : index
    %219 = vector.load %arg12[%c1_103, %c0_104, %c0_105] : memref<2x1x64xf32, #tpu.memory_space<vmem>>, vector<1x1x64xf32>
    %220 = vector.shape_cast %219 : vector<1x1x64xf32> to vector<1x64xf32>
    %221 = vector.broadcast %220 : vector<1x64xf32> to vector<8x64xf32>
    %222 = arith.addf %218, %221 : vector<8x64xf32>
    %cst_106 = arith.constant 5.000000e-01 : f32
    %223 = vector.broadcast %cst_106 : f32 to vector<8x64xf32>
    %224 = arith.mulf %223, %222 : vector<8x64xf32>
    %cst_107 = arith.constant 4.471500e-02 : f32
    %225 = vector.broadcast %cst_107 : f32 to vector<8x64xf32>
    %226 = arith.mulf %225, %222 : vector<8x64xf32>
    %227 = arith.mulf %226, %222 : vector<8x64xf32>
    %228 = arith.mulf %227, %222 : vector<8x64xf32>
    %229 = arith.addf %222, %228 : vector<8x64xf32>
    %cst_108 = arith.constant 0.797884583 : f32
    %230 = vector.broadcast %cst_108 : f32 to vector<8x64xf32>
    %231 = arith.mulf %230, %229 : vector<8x64xf32>
    %232 = math.tanh %231 : vector<8x64xf32>
    %cst_109 = arith.constant 1.000000e+00 : f32
    %233 = vector.broadcast %cst_109 : f32 to vector<8x64xf32>
    %234 = arith.addf %233, %232 : vector<8x64xf32>
    %235 = arith.mulf %224, %234 : vector<8x64xf32>
    %c1_110 = arith.constant 1 : index
    %c0_111 = arith.constant 0 : index
    %c0_112 = arith.constant 0 : index
    %236 = vector.load %arg13[%c1_110, %c0_111, %c0_112] : memref<2x64x32xf32, #tpu.memory_space<vmem>>, vector<1x64x32xf32>
    %237 = vector.shape_cast %236 : vector<1x64x32xf32> to vector<64x32xf32>
    %cst_113 = arith.constant dense<0.000000e+00> : vector<8x32xf32>
    %238 = tpu.matmul %235, %237, %cst_113 {dimension_numbers = #tpu.dot_dimension_numbers<[1], [0], [0], [1], [0, 0, 1, 1], [], []>} : vector<8x64xf32>, vector<64x32xf32>, vector<8x32xf32> -> vector<8x32xf32>
    %c1_114 = arith.constant 1 : index
    %c0_115 = arith.constant 0 : index
    %c0_116 = arith.constant 0 : index
    %239 = vector.load %arg14[%c1_114, %c0_115, %c0_116] : memref<2x1x32xf32, #tpu.memory_space<vmem>>, vector<1x1x32xf32>
    %240 = vector.shape_cast %239 : vector<1x1x32xf32> to vector<1x32xf32>
    %241 = vector.broadcast %240 : vector<1x32xf32> to vector<8x32xf32>
    %242 = arith.addf %238, %241 : vector<8x32xf32>
    %243 = arith.addf %215, %242 : vector<8x32xf32>
    %c1_117 = arith.constant 1 : index
    %c0_118 = arith.constant 0 : index
    %c0_119 = arith.constant 0 : index
    %244 = vector.load %arg15[%c1_117, %c0_118, %c0_119] : memref<2x1x32xf32, #tpu.memory_space<vmem>>, vector<1x1x32xf32>
    %245 = vector.shape_cast %244 : vector<1x1x32xf32> to vector<1x32xf32>
    %c1_120 = arith.constant 1 : index
    %c0_121 = arith.constant 0 : index
    %c0_122 = arith.constant 0 : index
    %246 = vector.load %arg16[%c1_120, %c0_121, %c0_122] : memref<2x1x32xf32, #tpu.memory_space<vmem>>, vector<1x1x32xf32>
    %247 = vector.shape_cast %246 : vector<1x1x32xf32> to vector<1x32xf32>
    %cst_123 = arith.constant dense<0.000000e+00> : vector<8xf32>
    %248 = vector.multi_reduction <add>, %243, %cst_123 [1] : vector<8x32xf32> to vector<8xf32>
    %249 = vector.shape_cast %248 : vector<8xf32> to vector<8x1xf32>
    %cst_124 = arith.constant 3.200000e+01 : f32
    %250 = vector.broadcast %cst_124 : f32 to vector<8x1xf32>
    %251 = arith.divf %249, %250 : vector<8x1xf32>
    %252 = vector.broadcast %251 : vector<8x1xf32> to vector<8x32xf32>
    %253 = arith.subf %243, %252 : vector<8x32xf32>
    %254 = arith.mulf %253, %253 : vector<8x32xf32>
    %cst_125 = arith.constant dense<0.000000e+00> : vector<8xf32>
    %255 = vector.multi_reduction <add>, %254, %cst_125 [1] : vector<8x32xf32> to vector<8xf32>
    %256 = vector.shape_cast %255 : vector<8xf32> to vector<8x1xf32>
    %cst_126 = arith.constant 3.200000e+01 : f32
    %257 = vector.broadcast %cst_126 : f32 to vector<8x1xf32>
    %258 = arith.divf %256, %257 : vector<8x1xf32>
    %259 = vector.broadcast %251 : vector<8x1xf32> to vector<8x32xf32>
    %260 = arith.subf %243, %259 : vector<8x32xf32>
    %cst_127 = arith.constant 9.99999996E-13 : f32
    %261 = vector.broadcast %cst_127 : f32 to vector<8x1xf32>
    %262 = arith.addf %258, %261 : vector<8x1xf32>
    %263 = math.rsqrt %262 : vector<8x1xf32>
    %264 = vector.broadcast %263 : vector<8x1xf32> to vector<8x32xf32>
    %265 = arith.mulf %260, %264 : vector<8x32xf32>
    %266 = vector.broadcast %245 : vector<1x32xf32> to vector<8x32xf32>
    %267 = arith.mulf %265, %266 : vector<8x32xf32>
    %268 = vector.broadcast %247 : vector<1x32xf32> to vector<8x32xf32>
    %269 = arith.addf %267, %268 : vector<8x32xf32>
    %270 = vector.extract_strided_slice %269 {offsets = [0, 0], sizes = [1, 32], strides = [1, 1]} : vector<8x32xf32> to vector<1x32xf32>
    %c0_128 = arith.constant 0 : index
    %c0_129 = arith.constant 0 : index
    %271 = vector.load %arg17[%c0_128, %c0_129] : memref<32x128xf32, #tpu.memory_space<vmem>>, vector<32x128xf32>
    %cst_130 = arith.constant dense<0.000000e+00> : vector<1x128xf32>
    %272 = tpu.matmul %270, %271, %cst_130 {dimension_numbers = #tpu.dot_dimension_numbers<[1], [0], [0], [1], [0, 0, 1, 1], [], []>} : vector<1x32xf32>, vector<32x128xf32>, vector<1x128xf32> -> vector<1x128xf32>
    %c0_131 = arith.constant 0 : index
    %c0_132 = arith.constant 0 : index
    %273 = vector.load %arg18[%c0_131, %c0_132] : memref<1x128xf32, #tpu.memory_space<vmem>>, vector<1x128xf32>
    %274 = arith.addf %272, %273 : vector<1x128xf32>
    %cst_133 = arith.constant 0.000000e+00 : f32
    %275 = vector.broadcast %cst_133 : f32 to vector<1x128xf32>
    %276 = arith.maximumf %274, %275 : vector<1x128xf32>
    %c0_134 = arith.constant 0 : index
    %c0_135 = arith.constant 0 : index
    %277 = vector.load %arg19[%c0_134, %c0_135] : memref<128x128xf32, #tpu.memory_space<vmem>>, vector<128x128xf32>
    %cst_136 = arith.constant dense<0.000000e+00> : vector<1x128xf32>
    %278 = tpu.matmul %276, %277, %cst_136 {dimension_numbers = #tpu.dot_dimension_numbers<[1], [0], [0], [1], [0, 0, 1, 1], [], []>} : vector<1x128xf32>, vector<128x128xf32>, vector<1x128xf32> -> vector<1x128xf32>
    %c0_137 = arith.constant 0 : index
    %c0_138 = arith.constant 0 : index
    %279 = vector.load %arg20[%c0_137, %c0_138] : memref<1x128xf32, #tpu.memory_space<vmem>>, vector<1x128xf32>
    %280 = arith.addf %278, %279 : vector<1x128xf32>
    %281 = vector.shape_cast %280 : vector<1x128xf32> to vector<1x1x128xf32>
    %c0_139 = arith.constant 0 : index
    %c0_140 = arith.constant 0 : index
    %c0_141 = arith.constant 0 : index
    %282 = vector.load %arg21[%c0_139, %c0_140, %c0_141] : memref<1x1x128xf32, #tpu.memory_space<vmem>>, vector<1x1x128xf32>
    tpu.vector_store %arg21[%c0_139, %c0_140, %c0_141], %281 {strides = array<i32>} : memref<1x1x128xf32, #tpu.memory_space<vmem>>, vector<1x1x128xf32>,
    return
  }
  func.func @transform_0(%arg0: i32) -> (i32, i32, i32) {
    %c0_i32 = arith.constant 0 : i32
    %c0_i32_0 = arith.constant 0 : i32
    %c0_i32_1 = arith.constant 0 : i32
    return %arg0, %c0_i32, %c0_i32_0 : i32, i32, i32
  }
  func.func @transform_1(%arg0: i32) -> (i32, i32, i32) {
    %c0_i32 = arith.constant 0 : i32
    %c0_i32_0 = arith.constant 0 : i32
    %c0_i32_1 = arith.constant 0 : i32
    return %arg0, %c0_i32, %c0_i32_0 : i32, i32, i32
  }
  func.func @transform_2(%arg0: i32) -> (i32, i32) {
    %c0_i32 = arith.constant 0 : i32
    %c0_i32_0 = arith.constant 0 : i32
    %c0_i32_1 = arith.constant 0 : i32
    return %c0_i32, %c0_i32_0 : i32, i32
  }
  func.func @transform_3(%arg0: i32) -> (i32, i32) {
    %c0_i32 = arith.constant 0 : i32
    %c0_i32_0 = arith.constant 0 : i32
    %c0_i32_1 = arith.constant 0 : i32
    return %c0_i32, %c0_i32_0 : i32, i32
  }
  func.func @transform_4(%arg0: i32) -> (i32, i32, i32) {
    %c0_i32 = arith.constant 0 : i32
    %c0_i32_0 = arith.constant 0 : i32
    %c0_i32_1 = arith.constant 0 : i32
    %c0_i32_2 = arith.constant 0 : i32
    return %c0_i32, %c0_i32_0, %c0_i32_1 : i32, i32, i32
  }
  func.func @transform_5(%arg0: i32) -> (i32, i32, i32) {
    %c0_i32 = arith.constant 0 : i32
    %c0_i32_0 = arith.constant 0 : i32
    %c0_i32_1 = arith.constant 0 : i32
    %c0_i32_2 = arith.constant 0 : i32
    return %c0_i32, %c0_i32_0, %c0_i32_1 : i32, i32, i32
  }
  func.func @transform_6(%arg0: i32) -> (i32, i32, i32) {
    %c0_i32 = arith.constant 0 : i32
    %c0_i32_0 = arith.constant 0 : i32
    %c0_i32_1 = arith.constant 0 : i32
    %c0_i32_2 = arith.constant 0 : i32
    return %c0_i32, %c0_i32_0, %c0_i32_1 : i32, i32, i32
  }
  func.func @transform_7(%arg0: i32) -> (i32, i32, i32) {
    %c0_i32 = arith.constant 0 : i32
    %c0_i32_0 = arith.constant 0 : i32
    %c0_i32_1 = arith.constant 0 : i32
    %c0_i32_2 = arith.constant 0 : i32
    return %c0_i32, %c0_i32_0, %c0_i32_1 : i32, i32, i32
  }
  func.func @transform_8(%arg0: i32) -> (i32, i32, i32) {
    %c0_i32 = arith.constant 0 : i32
    %c0_i32_0 = arith.constant 0 : i32
    %c0_i32_1 = arith.constant 0 : i32
    %c0_i32_2 = arith.constant 0 : i32
    return %c0_i32, %c0_i32_0, %c0_i32_1 : i32, i32, i32
  }
  func.func @transform_9(%arg0: i32) -> (i32, i32, i32) {
    %c0_i32 = arith.constant 0 : i32
    %c0_i32_0 = arith.constant 0 : i32
    %c0_i32_1 = arith.constant 0 : i32
    %c0_i32_2 = arith.constant 0 : i32
    return %c0_i32, %c0_i32_0, %c0_i32_1 : i32, i32, i32
  }
  func.func @transform_10(%arg0: i32) -> (i32, i32, i32) {
    %c0_i32 = arith.constant 0 : i32
    %c0_i32_0 = arith.constant 0 : i32
    %c0_i32_1 = arith.constant 0 : i32
    %c0_i32_2 = arith.constant 0 : i32
    return %c0_i32, %c0_i32_0, %c0_i32_1 : i32, i32, i32
  }
  func.func @transform_11(%arg0: i32) -> (i32, i32, i32) {
    %c0_i32 = arith.constant 0 : i32
    %c0_i32_0 = arith.constant 0 : i32
    %c0_i32_1 = arith.constant 0 : i32
    %c0_i32_2 = arith.constant 0 : i32
    return %c0_i32, %c0_i32_0, %c0_i32_1 : i32, i32, i32
  }
  func.func @transform_12(%arg0: i32) -> (i32, i32, i32) {
    %c0_i32 = arith.constant 0 : i32
    %c0_i32_0 = arith.constant 0 : i32
    %c0_i32_1 = arith.constant 0 : i32
    %c0_i32_2 = arith.constant 0 : i32
    return %c0_i32, %c0_i32_0, %c0_i32_1 : i32, i32, i32
  }
  func.func @transform_13(%arg0: i32) -> (i32, i32, i32) {
    %c0_i32 = arith.constant 0 : i32
    %c0_i32_0 = arith.constant 0 : i32
    %c0_i32_1 = arith.constant 0 : i32
    %c0_i32_2 = arith.constant 0 : i32
    return %c0_i32, %c0_i32_0, %c0_i32_1 : i32, i32, i32
  }
  func.func @transform_14(%arg0: i32) -> (i32, i32, i32) {
    %c0_i32 = arith.constant 0 : i32
    %c0_i32_0 = arith.constant 0 : i32
    %c0_i32_1 = arith.constant 0 : i32
    %c0_i32_2 = arith.constant 0 : i32
    return %c0_i32, %c0_i32_0, %c0_i32_1 : i32, i32, i32
  }
  func.func @transform_15(%arg0: i32) -> (i32, i32, i32) {
    %c0_i32 = arith.constant 0 : i32
    %c0_i32_0 = arith.constant 0 : i32
    %c0_i32_1 = arith.constant 0 : i32
    %c0_i32_2 = arith.constant 0 : i32
    return %c0_i32, %c0_i32_0, %c0_i32_1 : i32, i32, i32
  }
  func.func @transform_16(%arg0: i32) -> (i32, i32) {
    %c0_i32 = arith.constant 0 : i32
    %c0_i32_0 = arith.constant 0 : i32
    %c0_i32_1 = arith.constant 0 : i32
    return %c0_i32, %c0_i32_0 : i32, i32
  }
  func.func @transform_17(%arg0: i32) -> (i32, i32) {
    %c0_i32 = arith.constant 0 : i32
    %c0_i32_0 = arith.constant 0 : i32
    %c0_i32_1 = arith.constant 0 : i32
    return %c0_i32, %c0_i32_0 : i32, i32
  }
  func.func @transform_18(%arg0: i32) -> (i32, i32) {
    %c0_i32 = arith.constant 0 : i32
    %c0_i32_0 = arith.constant 0 : i32
    %c0_i32_1 = arith.constant 0 : i32
    return %c0_i32, %c0_i32_0 : i32, i32
  }
  func.func @transform_19(%arg0: i32) -> (i32, i32) {
    %c0_i32 = arith.constant 0 : i32
    %c0_i32_0 = arith.constant 0 : i32
    %c0_i32_1 = arith.constant 0 : i32
    return %c0_i32, %c0_i32_0 : i32, i32
  }
  func.func @transform_20(%arg0: i32) -> (i32, i32, i32) {
    %c0_i32 = arith.constant 0 : i32
    %c0_i32_0 = arith.constant 0 : i32
    %c0_i32_1 = arith.constant 0 : i32
    return %arg0, %c0_i32, %c0_i32_0 : i32, i32, i32
  }
}

</mosaic_0001>

<bundles_post_ra>
// kernel: bert_classifier_forward.1
= control target key start
LH: loop header
LB: loop body
LE: loop exit
PB: predicated region body
PF: predicated region fallthrough
CT: control target
= control target key end

     0   :  { %s5798_s0 = inlined_call_operand.vmem [shape: f32[2,8,32], index: 0, kind: input, shape index: {}]   ;;  %s5799_s1 = inlined_call_operand.vmem [shape: f32[2,1,8], index: 1, kind: input, shape index: {}]   ;;  %s5800_s2 = inlined_call_operand.vmem [shape: f32[1,32], index: 2, kind: input, shape index: {}]   ;;  %s5801_s3 = inlined_call_operand.vmem [shape: f32[1,32], index: 3, kind: input, shape index: {}]   ;;  %s5802_s4 = inlined_call_operand.vmem [shape: f32[2,32,96], index: 4, kind: input, shape index: {}]   ;;  %s5803_s5 = inlined_call_operand.vmem [shape: f32[2,1,96], index: 5, kind: input, shape index: {}]   ;;  %s5804_s6 = inlined_call_operand.vmem [shape: f32[2,32,32], index: 6, kind: input, shape index: {}]   ;;  %s5805_s7 = inlined_call_operand.vmem [shape: f32[2,1,32], index: 7, kind: input, shape index: {}]   ;;  %s5806_s8 = inlined_call_operand.vmem [shape: f32[2,1,32], index: 8, kind: input, shape index: {}]   ;;  %s5807_s9 = inlined_call_operand.vmem [shape: f32[2,1,32], index: 9, kind: input, shape index: {}]   ;;  %s5808_s10 = inlined_call_operand.vmem [shape: f32[2,32,64], index: 10, kind: input, shape index: {}]   ;;  %s5809_s11 = inlined_call_operand.vmem [shape: f32[2,1,64], index: 11, kind: input, shape index: {}]   ;;  %s5810_s12 = inlined_call_operand.vmem [shape: f32[2,64,32], index: 12, kind: input, shape index: {}]   ;;  %s5811_s13 = inlined_call_operand.vmem [shape: f32[2,1,32], index: 13, kind: input, shape index: {}]   ;;  %s5812_s14 = inlined_call_operand.vmem [shape: f32[2,1,32], index: 14, kind: input, shape index: {}]   ;;  %s5813_s15 = inlined_call_operand.vmem [shape: f32[2,1,32], index: 15, kind: input, shape index: {}]   ;;  %s5814_s16 = inlined_call_operand.vmem [shape: f32[32,128], index: 16, kind: input, shape index: {}]   ;;  %s5815_s17 = inlined_call_operand.vmem [shape: f32[1,128], index: 17, kind: input, shape index: {}]   ;;  %s5816_s18 = inlined_call_operand.vmem [shape: f32[128,128], index: 18, kind: input, shape index: {}]   ;;  %s5817_s19 = inlined_call_operand.vmem [shape: f32[1,128], index: 19, kind: input, shape index: {}]   ;;  %s5818_s20 = inlined_call_operand.hbm [shape: f32[2,1,128], index: 20, kind: output, shape index: {}]  }
   0x1   :  { %5835 = sst [smem:[#allocation10_spill]] %s5798_s0 }
   0x2   :  { %5836 = sst [smem:[#allocation11_spill]] %s5799_s1 }
   0x3   :  { %5837 = sst [smem:[#allocation12_spill]] %s5800_s2 }
   0x4   :  { %5838 = sst [smem:[#allocation13_spill]] %s5801_s3 }
   0x5   :  { %5839 = sst [smem:[#allocation14_spill]] %s5802_s4 }
   0x6   :  { %25 = vsyncpa [#allocation3], 0 }
   0x7   :  { %27 = vsyncpa [#allocation3 + $0x1], 0  ;;  %s5028_s1 = smov 0   ;;  %s5030_s22 = smov 0  }
   0x8   :  { %s5032_s23 = smov 0   ;;  %s5034_s24 = smov 0  }
   0x9 LB: > { %5840 = sst [smem:[#allocation5_spill]] %s4895_s1  ;;  %s5049_s2 = sadd.s32 4294967295, %s4907_s24   ;;  %s4907_s24 = sphi %s5034_s24, %s5861_s24   ;;  %s4903_s23 = sphi %s5032_s23, %s5863_s23   ;;  %s4899_s22 = sphi %s5030_s22, %s5865_s22   ;;  %s4895_s1 = sphi %s5028_s1, %s5864_s1  }
   0xa   : > { %5841 = sst [smem:[#allocation6_spill]] %s4903_s23  ;;  %s4221_s25 = sadd.s32 4294967294, %s4907_s24  }
   0xb   : > { %s5053_s3 = sadd.s32 1, %s4907_s24   ;;  %s470_s26 = sadd.s32 1, %s4903_s23 }
   0xc   : > { %5842 = sst [smem:[#allocation7_spill]] %s5053_s3  ;;  %s467_s27 = ssub.s32 %s4907_s24, %s5053_s3 }
   0xd   : > { %p480_p0 = scmp.ne.s32.totalorder %s4903_s23, %s4899_s22  ;;  %p468_p1 = scmp.eq.s32.totalorder %s467_s27, 0 }
   0xe   : > { %p481_p2 = scmp.eq.s32.totalorder %s5049_s2, 1  ;;  %p486_p3 = scmp.ne.s32.totalorder %s4899_s22, %s4895_s1 }
   0xf   : > { %p487_p4 = scmp.eq.s32.totalorder %s4221_s25, 1  ;;  %p4224_p7 = scmp.ge.s32.totalorder %s4907_s24, 1 }
  0x10   : > { %s5064_s28 = scalar_select %p468_p1, %s4903_s23, %s470_s26  }
  0x11   : > { %p5066_p5 = por %p481_p2, %p480_p0  ;;  %p5070_p6 = por %p487_p4, %p486_p3 }
  0x12   : > { %5843 = sst [smem:[#allocation8_spill]] %s5064_s28  ;;  %p572_p8 = scmp.lt.s32.totalorder %s4907_s24, 3 }
  0x13   : > { %s5845_s29 = scalar_select %p5070_p6, 1, 0 }
  0x14   : > { %p573_p9 = pnand %p4224_p7, %p572_p8 }
  0x15   : > { %5846 = sst [smem:[#allocation9_spill]] %s5845_s29  ;;  %p631_p10 = scmp.lt.s32.totalorder (!%p573_p9), %s5049_s2, 1  ;;  %vm641_vm0 = vcmask (!%p573_p9), 261120   ;;  %v4909_v10 = vmov (!%p573_p9), 0.0|0.0   ;;  %vm4910_vm1 = vmmov (!%p573_p9), 0   ;;  %v4911_v13 = vmov (!%p573_p9), 0.0  }
  0x16   : > { %576 = sbr.rel (%p573_p9) target bundleno = 6129 (0x17f1), region = 100  ;;  %s5847_s26 = sld [smem:[#allocation10_spill]] (!%p573_p9)  ;;  %4657 = vmatprep.subr.bf16.mxu0 (!%p573_p9), %v4909_v10  ;;  %4435 = vmatprep.mubr.msk.f32.mxu0 (!%p573_p9), %vm4910_vm1, %v4911_v13  ;;  %v4228_v24 = vld [vmem:[%s5803_s5] ss:$0 sm:$0xff] (!%p573_p9)  ;;  %v4916_v31 = vmov (!%p573_p9), 1983009808   ;;  %v770_v33 = vlaneseq (!%p573_p9) }
  0x17   : > { %s5848_s3 = sld [smem:[#allocation14_spill]] (!%p573_p9)  ;;  %4443 = vmatprep.subr.mxu1 (!%p573_p9), %v4911_v13  ;;  %4445 = vmatprep.mubr.msk.f32.mxu1 (!%p573_p9), %vm4910_vm1, %v4911_v13  ;;  %s5849_s28 = sld [smem:[#allocation12_spill]] (!%p573_p9)  ;;  %v768_v32 = vunpack.c.l.s4 (!%p573_p9), %v4916_v31  ;;  %v4917_v36 = vmov (!%p573_p9), 1934713408   ;;  %vm1203_vm2 = vcmask (!%p573_p9), 64512   ;;  %vm1993_vm3 = vcmask (!%p573_p9), 130048  }
  0x18   : > { %s5833_s1 = smov (!%p573_p9), 120   ;;  %s4914_s23 = smov (!%p573_p9), 112   ;;  %v771_v35 = vshrl.u32 (!%p573_p9), %v770_v33, 7  ;;  %v800_v37 = vunpack.c.l.s4 (!%p573_p9), %v4917_v36  ;;  %vm1995_vm4 = vcmask (!%p573_p9), 195584   ;;  %vm2219_vm5 = vcmask (!%p573_p9), 523264  }
  0x19   : > { %v769_v34 = vunpack.c.0.s8 (!%p573_p9), %v768_v32  ;;  %s5825_s25 = smov (!%p573_p9), 24   ;;  %s629_s29 = sand.u32 (!%p573_p9), 1, %s4899_s22  }
  0x1a   : > { %v801_v44 = vunpack.c.0.s8 (!%p573_p9), %v800_v37 }
  0x1b   : > { %v5147_v41 = vsub.s32 (!%p573_p9), %v769_v34, %v771_v35 }
  0x1c   : > { %v5157_v50 = vsub.s32 (!%p573_p9), %v801_v44, %v771_v35 }
  0x1d   : > { %s5078_s30 = scalar_select %p631_p10, %s5049_s2, 1  ;;  %v671_v7 = vld [vmem:[%s5848_s3] sm:$0xff]  ;;  %v672_v8 = vld [vmem:[%s5848_s3 + $0x8] sm:$0xff]  ;;  %v673_v9 = vld [vmem:[%s5848_s3 + $0x10] sm:$0xff] }
  0x1e   : > { %v4658_v11 = vpack.c.bf16 %v672_v8, %v671_v7  ;;  %v674_v12 = vld [vmem:[%s5848_s3 + $0x18] sm:$0xff]  ;;  %v4226_v19 = vld [vmem:[%s5849_s28] ss:$0 sm:$0xff]  ;;  %s5830_s28 = smov 96  }
  0x1f   : > { %s4225_s0 = sshll.u32 %s5078_s30, 3  ;;  %v4661_v14 = vpack.c.bf16 %v674_v12, %v673_v9 }
  0x20   : > { %s634_s27 = scalar_lea.vmem %s5847_s26, %s4225_s0  ;;  %4659 = vmatpush3.bf16.msra.mxu0 %v4658_v11  ;;  %s5850_s0 = sld [smem:[#allocation13_spill]] }
  0x21   : > { %v638_v0 = vld [vmem:[%s634_s27] sm:$0xff]  ;;  %4660 = vmatprep.subr.bf16.mxu0 %v4909_v10  ;;  %s5832_s26 = smov 104  }
  0x22   : > { %v642_v1 = vsel %vm641_vm0, %v638_v0, 0.0 }
  0x23   : > { %643 = vadd.xlane.f32.xlu0 %v642_v1 }
  0x24   : > { %4662 = vmatpush3.bf16.msra.mxu0 %v4661_v14 }
  0x25   : > { %4438 = vmatprep.subr.mxu0 %v4911_v13 }
  0x26   : > { %v4227_v21 = vld [vmem:[%s5850_s0] ss:$0 sm:$0xff]  ;;  %s5851_s0 = sld [smem:[#allocation11_spill]] }
  0x2c   : > { %s637_s21 = scalar_lea.vmem %s5851_s0, %s5078_s30  ;;  %s5828_s30 = smov 64  }
  0x2d   : > { %s5827_s0 = smov 16  }
  0xb0   : > { %v644_v2 = vpop.xlane.xlu0 %643 }
  0xb1   : > { %v646_v3 = vmul.f32 0.03125, %v644_v2 }
  0xb3   : > { %v647_v4 = vsub.f32 %v638_v0, %v646_v3 }
  0xb5   : > { %v648_v5 = vmul.f32 %v647_v4, %v647_v4 }
  0xb7   : > { %v649_v6 = vsel %vm641_vm0, %v648_v5, 0.0 }
  0xb8   : > { %650 = vadd.xlane.f32.xlu0 %v649_v6 }
 0x145   : > { %v651_v15 = vpop.xlane.xlu0 %650 }
 0x146   : > { %v652_v16 = vmul.f32 0.03125, %v651_v15 }
 0x148   : > { %v653_v17 = vadd.f32 1e-12, %v652_v16 }
 0x14a   : > { %4799 = vrsqrt.f32 %v653_v17 }
 0x154   : > { %v4800_v18 = vpop.eup %4799 }
 0x155   : > { %v655_v20 = vmul.f32 %v4800_v18, %v647_v4 }
 0x157   : > { %v662_v22 = vmul.f32 %v4226_v19, %v655_v20 }
 0x159   : > { %v5112_v23 = vadd.f32 %v4227_v21, %v662_v22 }
 0x15b   : > { %4436 = vmatmul.mubr.msk.f32.vlgmr.msra.gmra.mrb[0].mxu0 %vm641_vm0, %v5112_v23 }
 0x15c   : > { %4440 = vmatprep.mubr.msk.f32.mxu0 %vm4910_vm1, %v4911_v13 }
 0x22e   : > { %v751_v25 = vpop.f32.mrb[0].mxu0 }
 0x22f   : > { %v5121_v26 = vadd.f32 %v4228_v24, %v751_v25  ;;  %v4437_v27 = vpop.f32.mrb[1].mxu0 }
 0x231   : > { %762 = vrot.lane.b32.xlu0 %v5121_v26, %s5832_s26  ;;  %756 = vrot.lane.b32.xlu1 %v5121_v26, %s5833_s1  ;;  %s5852_s1 = smov 120   ;;  %s5854_s26 = smov 96  }
 0x235   : > { %759 = vrot.lane.b32.xlu1 %v5121_v26, %s4914_s23 }
 0x239   : > { %901 = vrot.lane.b32.xlu1 %v5121_v26, %s5830_s28 }
 0x2a3   : > { %v5131_v28 = vpop.permute.xlu1 %756  ;;  %v5139_v30 = vpop.permute.xlu0 %762 }
 0x2a4   : > { %903 = vrot.lane.b32.xlu1 %v5131_v28, %s5830_s28  ;;  %v781_v42 = vcombine.low %v5131_v28, %v5139_v30  ;;  %v782_v43 = vcombine.high %v5131_v28, %v5139_v30 }
 0x2a6   : > { %v789_v48 = vrot.slane %v781_v42, %v5147_v41  ;;  %v796_v49 = vrot.slane %v782_v43, %v5147_v41 }
 0x2a7   : > { %v5135_v29 = vpop.permute.xlu1 %759 }
 0x2a8   : > { %905 = vrot.lane.b32.xlu1 %v5135_v29, %s5830_s28  ;;  %v765_v38 = vcombine.low %v5121_v26, %v5135_v29  ;;  %v766_v39 = vcombine.high %v5121_v26, %v5135_v29 }
 0x2aa   : > { %v773_v45 = vrot.slane %v765_v38, %v5147_v41  ;;  %v780_v46 = vrot.slane %v766_v39, %v5147_v41 }
 0x2ab   : > { %v902_v40 = vpop.permute.xlu1 %901 }
 0x2ac   : > { %907 = vrot.lane.b32.xlu1 %v5139_v30, %s5830_s28  ;;  %v797_v51 = vcombine.low %v773_v45, %v789_v48  ;;  %v798_v52 = vcombine.high %v773_v45, %v789_v48  ;;  %v813_v53 = vcombine.low %v780_v46, %v796_v49  ;;  %v814_v54 = vcombine.high %v780_v46, %v796_v49  ;;  %s5858_s28 = smov 24  }
 0x2ae   : > { %v805_v58 = vrot.slane %v797_v51, %v5157_v50  ;;  %v812_v59 = vrot.slane %v798_v52, %v5157_v50  ;;  %v821_v60 = vrot.slane %v813_v53, %v5157_v50  ;;  %v828_v61 = vrot.slane %v814_v54, %v5157_v50 }
 0x2b0   : > { %v833_v5 = vcombine.low %v805_v58, %v812_v59  ;;  %v4230_v6 = vcombine.high %v805_v58, %v812_v59  ;;  %v849_v7 = vcombine.low %v821_v60, %v828_v61  ;;  %v4231_v8 = vcombine.high %v821_v60, %v828_v61 }
 0x2b2   : > { %v840_v19 = vrot.slane %v833_v5, %v5147_v41  ;;  %v848_v20 = vrot.slane %v4230_v6, %v5147_v41  ;;  %v856_v21 = vrot.slane %v849_v7, %v5147_v41  ;;  %v864_v22 = vrot.slane %v4231_v8, %v5147_v41 }
 0x2b4   : > { %v865_v36 = vcombine.low %v840_v19, %v848_v20  ;;  %v881_v37 = vcombine.low %v856_v21, %v864_v22  ;;  %v866_v45 = vcombine.high %v840_v19, %v848_v20  ;;  %v882_v48 = vcombine.high %v856_v21, %v864_v22 }
 0x2b6   : > { %v873_v46 = vrot.slane %v865_v36, %v5157_v50  ;;  %v880_v54 = vrot.slane %v866_v45, %v5157_v50 }
 0x316   : > { %v904_v47 = vpop.permute.xlu1 %903 }
 0x31a   : > { %v906_v55 = vpop.permute.xlu1 %905 }
 0x31b   : > { %v913_v56 = vcombine.low %v902_v40, %v906_v55  ;;  %v914_v57 = vcombine.high %v902_v40, %v906_v55 }
 0x31d   : > { %v921_v1 = vrot.slane %v913_v56, %v5147_v41  ;;  %v928_v2 = vrot.slane %v914_v57, %v5147_v41  ;;  %v896_v57 = vrot.slane %v882_v48, %v5157_v50 }
 0x31e   : > { %v908_v62 = vpop.permute.xlu1 %907 }
 0x31f   : > { %v929_v63 = vcombine.low %v904_v47, %v908_v62  ;;  %v930_v0 = vcombine.high %v904_v47, %v908_v62  ;;  %v889_v47 = vrot.slane %v881_v37, %v5157_v50  ;;  %v899_v60 = vcombine.low %v880_v54, %v896_v57  ;;  %v5211_v62 = vld [vmem:[%s637_s21] ss:$0 sm:$0xff]  ;;  %s5826_s21 = smov 8  }
 0x320   : > { %v900_v61 = vcombine.high %v880_v54, %v896_v57 }
 0x321   : > { %v937_v3 = vrot.slane %v929_v63, %v5147_v41  ;;  %v944_v4 = vrot.slane %v930_v0, %v5147_v41  ;;  %v897_v55 = vcombine.low %v873_v46, %v889_v47  ;;  %v898_v56 = vcombine.high %v873_v46, %v889_v47 }
 0x323   : > { %v945_v9 = vcombine.low %v921_v1, %v937_v3  ;;  %v946_v11 = vcombine.high %v921_v1, %v937_v3  ;;  %v961_v12 = vcombine.low %v928_v2, %v944_v4  ;;  %v962_v14 = vcombine.high %v928_v2, %v944_v4 }
 0x325   : > { %v953_v15 = vrot.slane %v945_v9, %v5157_v50  ;;  %v960_v16 = vrot.slane %v946_v11, %v5157_v50  ;;  %v969_v17 = vrot.slane %v961_v12, %v5157_v50  ;;  %v976_v18 = vrot.slane %v962_v14, %v5157_v50 }
 0x327   : > { %v981_v24 = vcombine.low %v953_v15, %v960_v16  ;;  %v4232_v25 = vcombine.high %v953_v15, %v960_v16  ;;  %v997_v27 = vcombine.low %v969_v17, %v976_v18  ;;  %v4233_v31 = vcombine.high %v969_v17, %v976_v18 }
 0x329   : > { %v988_v32 = vrot.slane %v981_v24, %v5147_v41  ;;  %v996_v33 = vrot.slane %v4232_v25, %v5147_v41  ;;  %v1004_v34 = vrot.slane %v997_v27, %v5147_v41  ;;  %v1012_v35 = vrot.slane %v4233_v31, %v5147_v41 }
 0x32b   : > { %v1013_v38 = vcombine.low %v988_v32, %v996_v33  ;;  %v1014_v39 = vcombine.high %v988_v32, %v996_v33  ;;  %v1029_v40 = vcombine.low %v1004_v34, %v1012_v35  ;;  %v1030_v42 = vcombine.high %v1004_v34, %v1012_v35 }
 0x32d   : > { %v1021_v43 = vrot.slane %v1013_v38, %v5157_v50  ;;  %v1037_v44 = vrot.slane %v1029_v40, %v5157_v50  ;;  %v1028_v52 = vrot.slane %v1014_v39, %v5157_v50  ;;  %v1044_v53 = vrot.slane %v1030_v42, %v5157_v50 }
 0x32f   : > { %v1045_v49 = vcombine.low %v1021_v43, %v1037_v44  ;;  %v1046_v51 = vcombine.high %v1021_v43, %v1037_v44  ;;  %v1047_v58 = vcombine.low %v1028_v52, %v1044_v53  ;;  %v1048_v59 = vcombine.high %v1028_v52, %v1044_v53 }
 0x331   : > { %4439 = vmatpush3.xpose.msk.msra.mxu0 %vm1203_vm2, %v1045_v49  ;;  %4444 = vmatpush3.xpose.msk.msra.mxu1 %vm1203_vm2, %v1046_v51 }
 0x332   : > { %4448 = vmatprep.subr.mxu0 %v4911_v13  ;;  %4453 = vmatprep.subr.mxu1 %v4911_v13 }
 0x334   : > { %4441 = vmatmul.mubr.msk.f32.vlgmr.msra.gmra.mrb[2].mxu0 %vm1203_vm2, %v897_v55  ;;  %4446 = vmatmul.mubr.msk.f32.vlgmr.msra.gmra.mrb[0].mxu1 %vm1203_vm2, %v898_v56 }
 0x335   : > { %4449 = vmatpush3.xpose.msk.msra.mxu0 %vm1203_vm2, %v1047_v58  ;;  %4454 = vmatpush3.xpose.msk.msra.mxu1 %vm1203_vm2, %v1048_v59 }
 0x336   : > { %4450 = vmatprep.mubr.msk.f32.mxu0 %vm4910_vm1, %v4911_v13  ;;  %4455 = vmatprep.mubr.msk.f32.mxu1 %vm4910_vm1, %v4911_v13 }
 0x337   : > { %4458 = vmatprep.subr.mxu0 %v4911_v13  ;;  %4463 = vmatprep.subr.mxu1 %v4911_v13 }
 0x338   : > { %4451 = vmatmul.mubr.msk.f32.vlgmr.msra.gmra.mrb[4].mxu0 %vm1203_vm2, %v899_v60  ;;  %4456 = vmatmul.mubr.msk.f32.vlgmr.msra.gmra.mrb[2].mxu1 %vm1203_vm2, %v900_v61 }
 0x339   : > { %4460 = vmatprep.mubr.msk.f32.mxu0 %vm4910_vm1, %v4911_v13  ;;  %4465 = vmatprep.mubr.msk.f32.mxu1 %vm4910_vm1, %v4911_v13 }
 0x407   : > { %v1276_v63 = vpop.f32.mrb[2].mxu0  ;;  %v1352_v0 = vpop.f32.mrb[0].mxu1 }
 0x408   : > { %v1277_v1 = vadd.f32 %v5211_v62, %v1276_v63  ;;  %v1353_v2 = vadd.f32 %v5211_v62, %v1352_v0  ;;  %v4442_v3 = vpop.f32.mrb[3].mxu0  ;;  %v4447_v4 = vpop.f32.mrb[1].mxu1 }
 0x40a   : > { %v1511_v5 = vsel %vm1203_vm2, %v1353_v2, -inf  ;;  %v1508_v6 = vsel %vm1203_vm2, %v1277_v1, -inf }
 0x40b   : > { %1512 = vmax.xlane.f32.xlu0 %v1511_v5  ;;  %v1504_v7 = vpop.f32.mrb[2].mxu1  ;;  %1509 = vmax.xlane.f32.xlu1 %v1508_v6  ;;  %v1428_v8 = vpop.f32.mrb[4].mxu0 }
 0x40c   : > { %v1505_v9 = vadd.f32 %v5211_v62, %v1504_v7  ;;  %v1429_v11 = vadd.f32 %v5211_v62, %v1428_v8  ;;  %v4452_v12 = vpop.f32.mrb[5].mxu0  ;;  %v4457_v14 = vpop.f32.mrb[3].mxu1 }
 0x40e   : > { %v1517_v15 = vsel %vm1203_vm2, %v1505_v9, -inf  ;;  %v1514_v16 = vsel %vm1203_vm2, %v1429_v11, -inf }
 0x40f   : > { %1518 = vmax.xlane.f32.xlu0 %v1517_v15  ;;  %1515 = vmax.xlane.f32.xlu1 %v1514_v16 }
 0x420   : > { %1049 = vrot.lane.b32.xlu1 %v5121_v26, %s5828_s30 }
 0x498   : > { %v1513_v17 = vpop.xlane.xlu0 %1512  ;;  %v1510_v18 = vpop.xlane.xlu1 %1509 }
 0x499   : > { %v1521_v19 = vsub.f32 %v1353_v2, %v1513_v17  ;;  %v1520_v20 = vsub.f32 %v1277_v1, %v1510_v18 }
 0x49b   : > { %v1526_v21 = vmul.f32 1.442695, %v1521_v19  ;;  %v1524_v22 = vmul.f32 1.442695, %v1520_v20 }
 0x49c   : > { %v1519_v24 = vpop.xlane.xlu0 %1518  ;;  %v1516_v25 = vpop.xlane.xlu1 %1515 }
 0x49d   : > { %4801 = vpow2.f32 %v1526_v21  ;;  %v1523_v27 = vsub.f32 %v1505_v9, %v1519_v24  ;;  %v1522_v31 = vsub.f32 %v1429_v11, %v1516_v25 }
 0x49e   : > { %4803 = vpow2.f32 %v1524_v22 }
 0x49f   : > { %v1530_v32 = vmul.f32 1.442695, %v1523_v27  ;;  %v1528_v33 = vmul.f32 1.442695, %v1522_v31 }
 0x4a0   : > { %v1050_v42 = vpop.permute.xlu1 %1049 }
 0x4a1   : > { %4805 = vpow2.f32 %v1530_v32 }
 0x4a2   : > { %4807 = vpow2.f32 %v1528_v33 }
 0x4a7   : > { %v5223_v34 = vpop.eup %4801 }
 0x4a8   : > { %v5225_v35 = vpop.eup %4803  ;;  %v1535_v26 = vsel %vm1203_vm2, %v5223_v34, 0.0 }
 0x4a9   : > { %1536 = vadd.xlane.f32.xlu0 %v1535_v26  ;;  %v1532_v36 = vsel %vm1203_vm2, %v5225_v35, 0.0 }
 0x4aa   : > { %1533 = vadd.xlane.f32.xlu1 %v1532_v36 }
 0x4ab   : > { %v5231_v37 = vpop.eup %4805 }
 0x4ac   : > { %v5233_v38 = vpop.eup %4807  ;;  %v1541_v39 = vsel %vm1203_vm2, %v5231_v37, 0.0 }
 0x4ad   : > { %1542 = vadd.xlane.f32.xlu0 %v1541_v39  ;;  %v1538_v40 = vsel %vm1203_vm2, %v5233_v38, 0.0 }
 0x4ae   : > { %1539 = vadd.xlane.f32.xlu1 %v1538_v40 }
 0x4bf   : > { %1053 = vrot.lane.b32.xlu1 %v5135_v29, %s5828_s30 }
 0x4c3   : > { %1055 = vrot.lane.b32.xlu1 %v5139_v30, %s5828_s30  ;;  %1051 = vrot.lane.b32.xlu0 %v5131_v28, %s5828_s30  ;;  %s630_s30 = scalar_lea.vmem [#allocation2], %s629_s29 }
 0x536   : > { %v1537_v43 = vpop.xlane.xlu0 %1536 }
 0x537   : > { %v1534_v44 = vpop.xlane.xlu1 %1533  ;;  %4809 = vrcp.f32 %v1537_v43 }
 0x538   : > { %4811 = vrcp.f32 %v1534_v44 }
 0x53a   : > { %v1543_v46 = vpop.xlane.xlu0 %1542 }
 0x53b   : > { %v1540_v45 = vpop.xlane.xlu1 %1539  ;;  %4813 = vrcp.f32 %v1543_v46 }
 0x53c   : > { %4815 = vrcp.f32 %v1540_v45 }
 0x53e   : > { %v1052_v51 = vpop.permute.xlu0 %1051 }
 0x53f   : > { %v1054_v47 = vpop.permute.xlu1 %1053 }
 0x540   : > { %v1061_v48 = vcombine.low %v1050_v42, %v1054_v47  ;;  %v1062_v49 = vcombine.high %v1050_v42, %v1054_v47 }
 0x541   : > { %v4810_v9 = vpop.eup %4809 }
 0x542   : > { %v1069_v29 = vrot.slane %v1061_v48, %v5147_v41  ;;  %v1076_v30 = vrot.slane %v1062_v49, %v5147_v41  ;;  %v4812_v16 = vpop.eup %4811  ;;  %v1549_v27 = vmul.f32 %v4810_v9, %v5223_v34  ;;  %v1997_v34 = vld [vmem:[%s5804_s6] sm:$0xff] }
 0x543   : > { %v1056_v52 = vpop.permute.xlu1 %1055  ;;  %v1548_v31 = vmul.f32 %v4812_v16, %v5225_v35  ;;  %v1998_v35 = vld [vmem:[%s5804_s6 + $0x8] sm:$0xff] }
 0x544   : > { %v1077_v53 = vcombine.low %v1052_v51, %v1056_v52  ;;  %v1078_v54 = vcombine.high %v1052_v51, %v1056_v52 }
 0x545   : > { %v4814_v19 = vpop.eup %4813 }
 0x546   : > { %v1085_v55 = vrot.slane %v1077_v53, %v5147_v41  ;;  %v1092_v28 = vrot.slane %v1078_v54, %v5147_v41  ;;  %v4816_v25 = vpop.eup %4815  ;;  %v1551_v26 = vmul.f32 %v4814_v19, %v5231_v37  ;;  %v4664_v37 = vpack.c.bf16 %v1998_v35, %v1997_v34 }
 0x547   : > { %v1550_v36 = vmul.f32 %v4816_v25, %v5233_v38 }
 0x548   : > { %v1093_v56 = vcombine.low %v1069_v29, %v1085_v55  ;;  %v1094_v57 = vcombine.high %v1069_v29, %v1085_v55  ;;  %v1109_v58 = vcombine.low %v1076_v30, %v1092_v28  ;;  %v1110_v59 = vcombine.high %v1076_v30, %v1092_v28 }
 0x54a   : > { %v1101_v60 = vrot.slane %v1093_v56, %v5157_v50  ;;  %v1108_v61 = vrot.slane %v1094_v57, %v5157_v50  ;;  %v1117_v63 = vrot.slane %v1109_v58, %v5157_v50  ;;  %v1124_v0 = vrot.slane %v1110_v59, %v5157_v50  ;;  %v1999_v57 = vld [vmem:[%s5804_s6 + $0x10] sm:$0xff]  ;;  %v2000_v58 = vld [vmem:[%s5804_s6 + $0x18] sm:$0xff] }
 0x54c   : > { %v1129_v1 = vcombine.low %v1101_v60, %v1108_v61  ;;  %v4234_v2 = vcombine.high %v1101_v60, %v1108_v61  ;;  %v1145_v3 = vcombine.low %v1117_v63, %v1124_v0  ;;  %v4235_v4 = vcombine.high %v1117_v63, %v1124_v0 }
 0x54d   : > { %v4667_v0 = vpack.c.bf16 %v2000_v58, %v1999_v57  ;;  %v2204_v57 = vld [vmem:[%s5810_s12] sm:$0xff]  ;;  %v2205_v58 = vld [vmem:[%s5810_s12 + $0x8] sm:$0xff] }
 0x54e   : > { %v1136_v5 = vrot.slane %v1129_v1, %v5147_v41  ;;  %v1144_v6 = vrot.slane %v4234_v2, %v5147_v41  ;;  %v1152_v7 = vrot.slane %v1145_v3, %v5147_v41  ;;  %v1160_v8 = vrot.slane %v4235_v4, %v5147_v41 }
 0x550   : > { %v1161_v11 = vcombine.low %v1136_v5, %v1144_v6  ;;  %v1177_v12 = vcombine.low %v1152_v7, %v1160_v8  ;;  %v1162_v14 = vcombine.high %v1136_v5, %v1144_v6  ;;  %v1178_v15 = vcombine.high %v1152_v7, %v1160_v8 }
 0x552   : > { %v1169_v17 = vrot.slane %v1161_v11, %v5157_v50  ;;  %v1185_v18 = vrot.slane %v1177_v12, %v5157_v50  ;;  %v1176_v20 = vrot.slane %v1162_v14, %v5157_v50  ;;  %v1192_v21 = vrot.slane %v1178_v15, %v5157_v50 }
 0x554   : > { %v1193_v22 = vcombine.low %v1169_v17, %v1185_v18  ;;  %v1194_v24 = vcombine.high %v1169_v17, %v1185_v18  ;;  %v1195_v32 = vcombine.low %v1176_v20, %v1192_v21  ;;  %v1196_v33 = vcombine.high %v1176_v20, %v1192_v21 }
 0x556   : > { %4459 = vmatpush3.msra.mxu0 %v1193_v22  ;;  %4464 = vmatpush3.msra.mxu1 %v1194_v24 }
 0x557   : > { %4461 = vmatmul.mubr.msk.f32.vlgmr.msra.gmra.mrb[6].mxu0 %vm1203_vm2, %v1548_v31  ;;  %4466 = vmatmul.mubr.msk.f32.vlgmr.msra.gmra.mrb[4].mxu1 %vm1203_vm2, %v1549_v27 }
 0x558   : > { %4468 = vmatprep.subr.mxu0 %v4911_v13  ;;  %4473 = vmatprep.subr.mxu1 %v4911_v13 }
 0x559   : > { %4469 = vmatpush3.msra.mxu0 %v1195_v32  ;;  %4474 = vmatpush3.msra.mxu1 %v1196_v33 }
 0x55a   : > { %4470 = vmatprep.mubr.msk.f32.mxu0 %vm4910_vm1, %v4911_v13  ;;  %4475 = vmatprep.mubr.msk.f32.mxu1 %vm4910_vm1, %v4911_v13 }
 0x55b   : > { %4471 = vmatmul.mubr.msk.f32.vlgmr.msra.gmra.mrb[8].mxu0 %vm1203_vm2, %v1550_v36  ;;  %4476 = vmatmul.mubr.msk.f32.vlgmr.msra.gmra.mrb[6].mxu1 %vm1203_vm2, %v1551_v26  ;;  %v4251_v26 = vld [vmem:[%s5805_s7] ss:$0 sm:$0xff] }
 0x55c   : > { %4663 = vmatprep.subr.bf16.mxu0 %v4909_v10  ;;  %4486 = vmatprep.mubr.msk.f32.mxu0 %vm4910_vm1, %v4911_v13 }
 0x55d   : > { %4687 = vmatprep.subr.bf16.mxu1 %v4909_v10  ;;  %4527 = vmatprep.mubr.msk.f32.mxu1 %vm4910_vm1, %v4911_v13 }
 0x55e   : > { %4665 = vmatpush3.bf16.msra.mxu0 %v4664_v37 }
 0x55f   : > { %4666 = vmatprep.subr.bf16.mxu0 %v4909_v10 }
 0x562   : > { %4668 = vmatpush3.bf16.msra.mxu0 %v4667_v0  ;;  %v2208_v0 = vld [vmem:[%s5810_s12 + $0x20] sm:$0xff] }
 0x563   : > { %4669 = vmatprep.subr.bf16.mxu0 %v4909_v10 }
 0x62a   : > { %v1621_v38 = vpop.f32.mrb[6].mxu0  ;;  %v1694_v39 = vpop.f32.mrb[4].mxu1 }
 0x62b   : > { %v4462_v40 = vpop.f32.mrb[7].mxu0  ;;  %v4467_v42 = vpop.f32.mrb[5].mxu1 }
 0x62e   : > { %v1767_v43 = vpop.f32.mrb[8].mxu0  ;;  %v1840_v44 = vpop.f32.mrb[6].mxu1 }
 0x62f   : > { %v1844_v45 = vcombine.low %v1621_v38, %v1767_v43  ;;  %v1845_v46 = vcombine.high %v1621_v38, %v1767_v43  ;;  %v1860_v47 = vcombine.low %v1694_v39, %v1840_v44  ;;  %v1861_v48 = vcombine.high %v1694_v39, %v1840_v44  ;;  %v4472_v49 = vpop.f32.mrb[9].mxu0  ;;  %v4477_v51 = vpop.f32.mrb[7].mxu1 }
 0x631   : > { %v1852_v52 = vrot.slane %v1844_v45, %v5147_v41  ;;  %v1859_v53 = vrot.slane %v1845_v46, %v5147_v41  ;;  %v1868_v54 = vrot.slane %v1860_v47, %v5147_v41  ;;  %v1875_v29 = vrot.slane %v1861_v48, %v5147_v41  ;;  %v2111_v45 = vld [vmem:[%s5808_s10] sm:$0xff]  ;;  %v2112_v46 = vld [vmem:[%s5808_s10 + $0x8] sm:$0xff]  ;;  %v2114_v48 = vld [vmem:[%s5808_s10 + $0x18] sm:$0xff] }
 0x632   : > { %v4670_v47 = vpack.c.bf16 %v2112_v46, %v2111_v45 }
 0x633   : > { %v1876_v30 = vcombine.low %v1852_v52, %v1868_v54  ;;  %v1877_v55 = vcombine.high %v1852_v52, %v1868_v54  ;;  %v1892_v28 = vcombine.low %v1859_v53, %v1875_v29  ;;  %v1893_v56 = vcombine.high %v1859_v53, %v1875_v29  ;;  %v4253_v29 = vld [vmem:[%s5806_s8] ss:$0 sm:$0xff] }
 0x635   : > { %v1884_v59 = vrot.slane %v1876_v30, %v5157_v50  ;;  %v1891_v60 = vrot.slane %v1877_v55, %v5157_v50  ;;  %v1900_v61 = vrot.slane %v1892_v28, %v5157_v50  ;;  %v1907_v63 = vrot.slane %v1893_v56, %v5157_v50  ;;  %v4254_v55 = vld [vmem:[%s5807_s9] ss:$0 sm:$0xff] }
 0x637   : > { %v1912_v1 = vcombine.low %v1884_v59, %v1891_v60  ;;  %v4249_v2 = vcombine.high %v1884_v59, %v1891_v60  ;;  %v1928_v3 = vcombine.low %v1900_v61, %v1907_v63  ;;  %v4250_v4 = vcombine.high %v1900_v61, %v1907_v63  ;;  %v2206_v60 = vld [vmem:[%s5810_s12 + $0x10] sm:$0xff]  ;;  %v2207_v61 = vld [vmem:[%s5810_s12 + $0x18] sm:$0xff] }
 0x638   : > { %v4676_v59 = vpack.c.bf16 %v2205_v58, %v2204_v57  ;;  %v4679_v63 = vpack.c.bf16 %v2207_v61, %v2206_v60 }
 0x639   : > { %v1919_v5 = vrot.slane %v1912_v1, %v5147_v41  ;;  %v1927_v6 = vrot.slane %v4249_v2, %v5147_v41  ;;  %v1935_v7 = vrot.slane %v1928_v3, %v5147_v41  ;;  %v1943_v8 = vrot.slane %v4250_v4, %v5147_v41  ;;  %v2209_v1 = vld [vmem:[%s5810_s12 + $0x28] sm:$0xff]  ;;  %v2210_v3 = vld [vmem:[%s5810_s12 + $0x30] sm:$0xff]  ;;  %v2211_v4 = vld [vmem:[%s5810_s12 + $0x38] sm:$0xff] }
 0x63a   : > { %v4682_v2 = vpack.c.bf16 %v2209_v1, %v2208_v0 }
 0x63b   : > { %v1945_v9 = vcombine.high %v1919_v5, %v1927_v6  ;;  %v1961_v11 = vcombine.high %v1935_v7, %v1943_v8  ;;  %v1944_v12 = vcombine.low %v1919_v5, %v1927_v6  ;;  %v1960_v14 = vcombine.low %v1935_v7, %v1943_v8  ;;  %v4255_v6 = vld [vmem:[%s5809_s11] ss:$0 sm:$0xff] }
 0x63c   : > { %v4685_v5 = vpack.c.bf16 %v2211_v4, %v2210_v3 }
 0x63d   : > { %v1959_v15 = vrot.slane %v1945_v9, %v5157_v50  ;;  %v1975_v16 = vrot.slane %v1961_v11, %v5157_v50  ;;  %v1952_v17 = vrot.slane %v1944_v12, %v5157_v50  ;;  %v1968_v18 = vrot.slane %v1960_v14, %v5157_v50 }
 0x63f   : > { %v1978_v19 = vcombine.low %v1959_v15, %v1975_v16  ;;  %v1977_v20 = vcombine.high %v1952_v17, %v1968_v18  ;;  %v1979_v21 = vcombine.high %v1959_v15, %v1975_v16  ;;  %v1976_v22 = vcombine.low %v1952_v17, %v1968_v18 }
 0x641   : > { %1985 = vrot.lane.b32.xlu1 %v1978_v19, %s5827_s0  ;;  %1981 = vrot.lane.b32.xlu0 %v1977_v20, %s5826_s21  ;;  %s5853_s0 = smov 104  }
 0x645   : > { %1989 = vrot.lane.b32.xlu0 %v1979_v21, %s5825_s25  ;;  %v4257_v21 = vld [vmem:[%s5811_s13] ss:$0 sm:$0xff]  ;;  %s4322_s25 = sshll.u32 %s5049_s2, 4  ;;  %s4922_s2 = smov [#allocation2]  }
 0x646   : > { %s4849_s21 = sshll.u32 %s4922_s2, 4  ;;  %s4850_s21 = int_to_ptr.vmem [resolvable:$false] %s4849_s21 }
 0x6b3   : > { %v1982_v24 = vpop.permute.xlu0 %1981  ;;  %v1986_v25 = vpop.permute.xlu1 %1985 }
 0x6b4   : > { %v1992_v27 = vsel %vm1203_vm2, %v1976_v22, %v1982_v24 }
 0x6b5   : > { %v1994_v32 = vsel %vm1993_vm3, %v1992_v27, %v1986_v25 }
 0x6b7   : > { %v1990_v31 = vpop.permute.xlu0 %1989 }
 0x6b8   : > { %v1996_v33 = vsel %vm1995_vm4, %v1994_v32, %v1990_v31 }
 0x6b9   : > { %4487 = vmatmul.mubr.msk.f32.vlgmr.msra.gmra.mrb[10].mxu0 %vm641_vm0, %v1996_v33 }
 0x6ba   : > { %4497 = vmatprep.mubr.msk.f32.mxu0 %vm4910_vm1, %v4911_v13  ;;  %4671 = vmatpush3.bf16.msra.mxu0 %v4670_v47  ;;  %v4259_v47 = vld [vmem:[%s5812_s14] ss:$0 sm:$0xff] }
 0x6bb   : > { %4672 = vmatprep.subr.bf16.mxu0 %v4909_v10 }
 0x78c   : > { %v2077_v36 = vpop.f32.mrb[10].mxu0 }
 0x78d   : > { %v2078_v34 = vadd.f32 %v4251_v26, %v2077_v36  ;;  %v4488_v35 = vpop.f32.mrb[11].mxu0 }
 0x78e   : > { %v4261_v35 = vld [vmem:[%s5848_s3 + $0x20] sm:$0xff] }
 0x78f   : > { %v2081_v37 = vadd.f32 %v2078_v34, %v5112_v23  ;;  %v2113_v23 = vld [vmem:[%s5808_s10 + $0x10] sm:$0xff] }
 0x790   : > { %v4673_v49 = vpack.c.bf16 %v2114_v48, %v2113_v23  ;;  %v4260_v48 = vld [vmem:[%s5813_s15] ss:$0 sm:$0xff] }
 0x791   : > { %v2084_v38 = vsel %vm641_vm0, %v2081_v37, 0.0 }
 0x792   : > { %2085 = vadd.xlane.f32.xlu1 %v2084_v38  ;;  %4674 = vmatpush3.bf16.msra.mxu0 %v4673_v49 }
 0x793   : > { %4675 = vmatprep.subr.bf16.mxu0 %v4909_v10 }
 0x81f   : > { %v2086_v39 = vpop.xlane.xlu1 %2085 }
 0x820   : > { %v2087_v40 = vmul.f32 0.03125, %v2086_v39  ;;  %v4263_v39 = vld [vmem:[%s5848_s3 + $0x30] sm:$0xff] }
 0x822   : > { %v2088_v42 = vsub.f32 %v2081_v37, %v2087_v40  ;;  %v4262_v37 = vld [vmem:[%s5848_s3 + $0x28] sm:$0xff]  ;;  %v4264_v40 = vld [vmem:[%s5848_s3 + $0x38] sm:$0xff]  ;;  %s4851_s3 = scalar_lea.vmem %s4850_s21, 32 }
 0x823   : > { %v4688_v38 = vpack.c.bf16 %v4262_v37, %v4261_v35 }
 0x824   : > { %v2089_v43 = vmul.f32 %v2088_v42, %v2088_v42 }
 0x825   : > { %4689 = vmatpush3.bf16.msra.mxu1 %v4688_v38 }
 0x826   : > { %v2090_v44 = vsel %vm641_vm0, %v2089_v43, 0.0  ;;  %4690 = vmatprep.subr.bf16.mxu1 %v4909_v10 }
 0x827   : > { %2091 = vadd.xlane.f32.xlu0 %v2090_v44 }
 0x8b4   : > { %v2092_v51 = vpop.xlane.xlu0 %2091 }
 0x8b5   : > { %v2093_v52 = vmul.f32 0.03125, %v2092_v51 }
 0x8b7   : > { %v2094_v53 = vadd.f32 1e-12, %v2093_v52  ;;  %v4266_v52 = vld [vmem:[%s5803_s5 + $0x1] ss:$0 sm:$0xff] }
 0x8b9   : > { %4817 = vrsqrt.f32 %v2094_v53 }
 0x8c3   : > { %v4818_v54 = vpop.eup %4817 }
 0x8c4   : > { %v2096_v30 = vmul.f32 %v4818_v54, %v2088_v42  ;;  %v4691_v42 = vpack.c.bf16 %v4264_v40, %v4263_v39 }
 0x8c6   : > { %v2103_v28 = vmul.f32 %v4253_v29, %v2096_v30  ;;  %4692 = vmatpush3.bf16.msra.mxu1 %v4691_v42 }
 0x8c7   : > { %4530 = vmatprep.subr.mxu1 %v4911_v13 }
 0x8c8   : > { %v2110_v56 = vadd.f32 %v4254_v55, %v2103_v28 }
 0x8ca   : > { %4498 = vmatmul.mubr.msk.f32.vlgmr.msra.gmra.mrb[12].mxu0 %vm641_vm0, %v2110_v56 }
 0x8cb   : > { %4516 = vmatprep.mubr.msk.f32.mxu0 %vm4910_vm1, %v4911_v13  ;;  %4677 = vmatpush3.bf16.msra.mxu0 %v4676_v59 }
 0x8cc   : > { %4678 = vmatprep.subr.bf16.mxu0 %v4909_v10 }
 0x8cf   : > { %4680 = vmatpush3.bf16.msra.mxu0 %v4679_v63 }
 0x8d0   : > { %4681 = vmatprep.subr.bf16.mxu0 %v4909_v10 }
 0x8d3   : > { %4683 = vmatpush3.bf16.msra.mxu0 %v4682_v2 }
 0x8d4   : > { %4684 = vmatprep.subr.bf16.mxu0 %v4909_v10 }
 0x8d7   : > { %4686 = vmatpush3.bf16.msra.mxu0 %v4685_v5 }
 0x8d8   : > { %4540 = vmatprep.subr.mxu0 %v4911_v13 }
 0x99d   : > { %v2191_v7 = vpop.f32.mrb[12].mxu0 }
 0x99e   : > { %v2192_v8 = vadd.f32 %v4255_v6, %v2191_v7  ;;  %v4499_v9 = vpop.f32.mrb[13].mxu0 }
 0x9a0   : > { %v2196_v11 = vmul.f32 0.044715, %v2192_v8  ;;  %v2195_v18 = vmul.f32 0.5, %v2192_v8 }
 0x9a2   : > { %v2197_v12 = vmul.f32 %v2196_v11, %v2192_v8 }
 0x9a4   : > { %v2198_v14 = vmul.f32 %v2197_v12, %v2192_v8 }
 0x9a6   : > { %v2199_v15 = vadd.f32 %v2198_v14, %v2192_v8 }
 0x9a8   : > { %v2200_v16 = vmul.f32 0.7978846, %v2199_v15 }
 0x9aa   : > { %4819 = vtanh.f32 %v2200_v16 }
 0x9b4   : > { %v4820_v17 = vpop.eup %4819 }
 0x9b5   : > { %v2202_v19 = vadd.f32 1.0, %v4820_v17 }
 0x9b7   : > { %v2203_v20 = vmul.f32 %v2202_v19, %v2195_v18 }
 0x9b9   : > { %4517 = vmatmul.mubr.msk.f32.vlgmr.msra.gmra.mrb[14].mxu0 %vm2219_vm5, %v2203_v20 }
 0x9ba   : > { %4542 = vmatprep.mubr.msk.f32.mxu0 %vm4910_vm1, %v4911_v13 }
 0xa8c   : > { %v2289_v22 = vpop.f32.mrb[14].mxu0 }
 0xa8d   : > { %v2290_v24 = vadd.f32 %v4257_v21, %v2289_v22  ;;  %v4518_v25 = vpop.f32.mrb[15].mxu0 }
 0xa8f   : > { %v2293_v27 = vadd.f32 %v2290_v24, %v2110_v56 }
 0xa91   : > { %v2296_v31 = vsel %vm641_vm0, %v2293_v27, 0.0 }
 0xa92   : > { %2297 = vadd.xlane.f32.xlu0 %v2296_v31 }
 0xb1f   : > { %v2298_v32 = vpop.xlane.xlu0 %2297 }
 0xb20   : > { %v2299_v33 = vmul.f32 0.03125, %v2298_v32 }
 0xb22   : > { %v2300_v26 = vsub.f32 %v2293_v27, %v2299_v33 }
 0xb24   : > { %v2301_v36 = vmul.f32 %v2300_v26, %v2300_v26 }
 0xb26   : > { %v2302_v34 = vsel %vm641_vm0, %v2301_v36, 0.0 }
 0xb27   : > { %2303 = vadd.xlane.f32.xlu1 %v2302_v34 }
 0xbb4   : > { %v2304_v43 = vpop.xlane.xlu1 %2303 }
 0xbb5   : > { %v2305_v44 = vmul.f32 0.03125, %v2304_v43 }
 0xbb7   : > { %v2306_v45 = vadd.f32 1e-12, %v2305_v44 }
 0xbb9   : > { %4821 = vrsqrt.f32 %v2306_v45 }
 0xbc3   : > { %v4822_v46 = vpop.eup %4821 }
 0xbc4   : > { %v2308_v23 = vmul.f32 %v4822_v46, %v2300_v26 }
 0xbc6   : > { %v2315_v49 = vmul.f32 %v4259_v47, %v2308_v23 }
 0xbc8   : > { %v5408_v51 = vadd.f32 %v4260_v48, %v2315_v49 }
 0xbca   : > { %4528 = vmatmul.mubr.msk.f32.vlgmr.msra.gmra.mrb[8].mxu1 %vm641_vm0, %v5408_v51 }
 0xbcb   : > { %4532 = vmatprep.mubr.msk.f32.mxu1 %vm4910_vm1, %v4911_v13 }
 0xc9d   : > { %v2405_v53 = vpop.f32.mrb[8].mxu1 }
 0xc9e   : > { %v5417_v54 = vadd.f32 %v4266_v52, %v2405_v53  ;;  %v4529_v29 = vpop.f32.mrb[9].mxu1 }
 0xca0   : > { %2413 = vrot.lane.b32.xlu1 %v5417_v54, %s4914_s23  ;;  %2410 = vrot.lane.b32.xlu0 %v5417_v54, %s5852_s1  ;;  %s5855_s23 = smov 64   ;;  %s4157_s1 = sshll.u32 %s630_s30, 4  ;;  %s5758_s1 = int_to_ptr.vmem [resolvable:$true] %s4157_s1 }
 0xca1   : > { %s4845_s27 = scalar_lea.vmem %s5758_s1, 16  ;;  %p4852_p0 = scmp.lt.s32.totalorder %s5758_s1, %s4850_s21 }
 0xca2   : > { %p4846_p11 = scmp.ne.s32.totalorder %s5758_s1, %s4845_s27  ;;  %p4853_p1 = scmp.lt.s32.totalorder %s4851_s3, %s4845_s27 }
 0xca4   : > { %2416 = vrot.lane.b32.xlu1 %v5417_v54, %s5853_s0  ;;  %2555 = vrot.lane.b32.xlu0 %v5417_v54, %s5854_s26  ;;  %p4847_p12 = pnand %p4846_p11, %p5066_p5  ;;  %p4854_p2 = por %p4853_p1, %p4852_p0 }
 0xca6   : > { %p4848_p13 = pneg %p4847_p12 }
 0xca8   : > { %p4855_p3 = pnand %p4854_p2, %p4848_p13 }
 0xd12   : > { %v5427_v30 = vpop.permute.xlu1 %2413  ;;  %v5429_v55 = vpop.permute.xlu0 %2410 }
 0xd13   : > { %2559 = vrot.lane.b32.xlu0 %v5427_v30, %s5854_s26  ;;  %2557 = vrot.lane.b32.xlu1 %v5429_v55, %s5854_s26  ;;  %v2419_v58 = vcombine.low %v5417_v54, %v5427_v30  ;;  %v2420_v59 = vcombine.high %v5417_v54, %v5427_v30 }
 0xd15   : > { %v2427_v0 = vrot.slane %v2419_v58, %v5147_v41  ;;  %v2434_v1 = vrot.slane %v2420_v59, %v5147_v41 }
 0xd16   : > { %v5435_v28 = vpop.permute.xlu1 %2416  ;;  %v2556_v63 = vpop.permute.xlu0 %2555 }
 0xd17   : > { %2561 = vrot.lane.b32.xlu1 %v5435_v28, %s5854_s26  ;;  %v2435_v56 = vcombine.low %v5429_v55, %v5435_v28  ;;  %v2436_v57 = vcombine.high %v5429_v55, %v5435_v28  ;;  %s5856_s26 = smov 16  }
 0xd19   : > { %v2443_v60 = vrot.slane %v2435_v56, %v5147_v41  ;;  %v2450_v61 = vrot.slane %v2436_v57, %v5147_v41 }
 0xd1b   : > { %v2451_v2 = vcombine.low %v2427_v0, %v2443_v60  ;;  %v2452_v3 = vcombine.high %v2427_v0, %v2443_v60  ;;  %v2467_v4 = vcombine.low %v2434_v1, %v2450_v61  ;;  %v2468_v5 = vcombine.high %v2434_v1, %v2450_v61 }
 0xd1d   : > { %v2459_v11 = vrot.slane %v2451_v2, %v5157_v50  ;;  %v2466_v12 = vrot.slane %v2452_v3, %v5157_v50  ;;  %v2475_v14 = vrot.slane %v2467_v4, %v5157_v50  ;;  %v2482_v15 = vrot.slane %v2468_v5, %v5157_v50 }
 0xd1f   : > { %v2487_v24 = vcombine.low %v2459_v11, %v2466_v12  ;;  %v4268_v25 = vcombine.high %v2459_v11, %v2466_v12  ;;  %v2503_v27 = vcombine.low %v2475_v14, %v2482_v15  ;;  %v4269_v31 = vcombine.high %v2475_v14, %v2482_v15 }
 0xd21   : > { %v2494_v39 = vrot.slane %v2487_v24, %v5147_v41  ;;  %v2502_v40 = vrot.slane %v4268_v25, %v5147_v41  ;;  %v2510_v42 = vrot.slane %v2503_v27, %v5147_v41  ;;  %v2518_v43 = vrot.slane %v4269_v31, %v5147_v41 }
 0xd23   : > { %v2519_v53 = vcombine.low %v2494_v39, %v2502_v40  ;;  %v2535_v29 = vcombine.low %v2510_v42, %v2518_v43  ;;  %v2520_v56 = vcombine.high %v2494_v39, %v2502_v40  ;;  %v2536_v57 = vcombine.high %v2510_v42, %v2518_v43 }
 0xd25   : > { %v2527_v3 = vrot.slane %v2519_v53, %v5157_v50  ;;  %v2543_v4 = vrot.slane %v2535_v29, %v5157_v50  ;;  %v2534_v5 = vrot.slane %v2520_v56, %v5157_v50 }
 0xd27   : > { %v2552_v14 = vcombine.high %v2527_v3, %v2543_v4 }
 0xd85   : > { %v2558_v6 = vpop.permute.xlu1 %2557  ;;  %v2560_v7 = vpop.permute.xlu0 %2559 }
 0xd86   : > { %v2567_v8 = vcombine.low %v2556_v63, %v2560_v7  ;;  %v2568_v9 = vcombine.high %v2556_v63, %v2560_v7 }
 0xd88   : > { %v2575_v19 = vrot.slane %v2567_v8, %v5147_v41  ;;  %v2582_v20 = vrot.slane %v2568_v9, %v5147_v41  ;;  %v2551_v9 = vcombine.low %v2527_v3, %v2543_v4 }
 0xd89   : > { %v2562_v16 = vpop.permute.xlu1 %2561 }
 0xd8a   : > { %v2583_v17 = vcombine.low %v2558_v6, %v2562_v16  ;;  %v2584_v18 = vcombine.high %v2558_v6, %v2562_v16  ;;  %v2550_v6 = vrot.slane %v2536_v57, %v5157_v50 }
 0xd8c   : > { %v2591_v21 = vrot.slane %v2583_v17, %v5147_v41  ;;  %v2598_v22 = vrot.slane %v2584_v18, %v5147_v41  ;;  %v2553_v11 = vcombine.low %v2534_v5, %v2550_v6  ;;  %v2554_v16 = vcombine.high %v2534_v5, %v2550_v6 }
 0xd8e   : > { %v2599_v32 = vcombine.low %v2575_v19, %v2591_v21  ;;  %v2600_v33 = vcombine.high %v2575_v19, %v2591_v21  ;;  %v2615_v26 = vcombine.low %v2582_v20, %v2598_v22  ;;  %v2616_v36 = vcombine.high %v2582_v20, %v2598_v22 }
 0xd90   : > { %v2607_v34 = vrot.slane %v2599_v32, %v5157_v50  ;;  %v2614_v35 = vrot.slane %v2600_v33, %v5157_v50  ;;  %v2623_v37 = vrot.slane %v2615_v26, %v5157_v50  ;;  %v2630_v38 = vrot.slane %v2616_v36, %v5157_v50 }
 0xd92   : > { %v2635_v44 = vcombine.low %v2607_v34, %v2614_v35  ;;  %v4270_v45 = vcombine.high %v2607_v34, %v2614_v35  ;;  %v2651_v46 = vcombine.low %v2623_v37, %v2630_v38  ;;  %v4271_v47 = vcombine.high %v2623_v37, %v2630_v38 }
 0xd94   : > { %v2642_v23 = vrot.slane %v2635_v44, %v5147_v41  ;;  %v2650_v48 = vrot.slane %v4270_v45, %v5147_v41  ;;  %v2658_v49 = vrot.slane %v2651_v46, %v5147_v41  ;;  %v2666_v52 = vrot.slane %v4271_v47, %v5147_v41 }
 0xd96   : > { %v2667_v58 = vcombine.low %v2642_v23, %v2650_v48  ;;  %v2668_v59 = vcombine.high %v2642_v23, %v2650_v48  ;;  %v2683_v60 = vcombine.low %v2658_v49, %v2666_v52  ;;  %v2684_v61 = vcombine.high %v2658_v49, %v2666_v52 }
 0xd98   : > { %v2675_v63 = vrot.slane %v2667_v58, %v5157_v50  ;;  %v2691_v0 = vrot.slane %v2683_v60, %v5157_v50  ;;  %v2682_v1 = vrot.slane %v2668_v59, %v5157_v50  ;;  %v2698_v2 = vrot.slane %v2684_v61, %v5157_v50 }
 0xd9a   : > { %v2699_v7 = vcombine.low %v2675_v63, %v2691_v0  ;;  %v2701_v8 = vcombine.low %v2682_v1, %v2698_v2  ;;  %v2700_v12 = vcombine.high %v2675_v63, %v2691_v0  ;;  %v2702_v15 = vcombine.high %v2682_v1, %v2698_v2 }
 0xd9c   : > { %4531 = vmatpush3.xpose.msk.msra.mxu1 %vm1203_vm2, %v2699_v7  ;;  %4541 = vmatpush3.xpose.msk.msra.mxu0 %vm1203_vm2, %v2701_v8 }
 0xd9d   : > { %4535 = vmatprep.subr.mxu1 %v4911_v13  ;;  %4550 = vmatprep.subr.mxu0 %v4911_v13 }
 0xd9f   : > { %4533 = vmatmul.mubr.msk.f32.vlgmr.msra.gmra.mrb[10].mxu1 %vm1203_vm2, %v2551_v9  ;;  %4543 = vmatmul.mubr.msk.f32.vlgmr.msra.gmra.mrb[16].mxu0 %vm1203_vm2, %v2553_v11 }
 0xda0   : > { %4536 = vmatpush3.xpose.msk.msra.mxu1 %vm1203_vm2, %v2700_v12  ;;  %4537 = vmatprep.mubr.msk.f32.mxu1 %vm4910_vm1, %v4911_v13 }
 0xda1   : > { %4545 = vmatprep.subr.mxu1 %v4911_v13  ;;  %4552 = vmatprep.mubr.msk.f32.mxu0 %vm4910_vm1, %v4911_v13 }
 0xda3   : > { %4538 = vmatmul.mubr.msk.f32.vlgmr.msra.gmra.mrb[12].mxu1 %vm1203_vm2, %v2552_v14 }
 0xda4   : > { %4546 = vmatpush3.xpose.msk.msra.mxu1 %vm1203_vm2, %v2702_v15  ;;  %4547 = vmatprep.mubr.msk.f32.mxu1 %vm4910_vm1, %v4911_v13 }
 0xda5   : > { %4555 = vmatprep.subr.mxu1 %v4911_v13 }
 0xda7   : > { %4548 = vmatmul.mubr.msk.f32.vlgmr.msra.gmra.mrb[14].mxu1 %vm1203_vm2, %v2554_v16 }
 0xda8   : > { %4557 = vmatprep.mubr.msk.f32.mxu1 %vm4910_vm1, %v4911_v13 }
 0xe72   : > { %v2923_v17 = vpop.f32.mrb[10].mxu1  ;;  %v3075_v18 = vpop.f32.mrb[16].mxu0 }
 0xe73   : > { %v2924_v19 = vadd.f32 %v5211_v62, %v2923_v17  ;;  %v4534_v20 = vpop.f32.mrb[11].mxu1  ;;  %v4544_v21 = vpop.f32.mrb[17].mxu0  ;;  %v3076_v22 = vadd.f32 %v5211_v62, %v3075_v18 }
 0xe75   : > { %v3155_v24 = vsel %vm1203_vm2, %v2924_v19, -inf  ;;  %v3161_v33 = vsel %vm1203_vm2, %v3076_v22, -inf }
 0xe76   : > { %3156 = vmax.xlane.f32.xlu0 %v3155_v24  ;;  %v2999_v25 = vpop.f32.mrb[12].mxu1 }
 0xe77   : > { %v3000_v27 = vadd.f32 %v5211_v62, %v2999_v25  ;;  %v4539_v31 = vpop.f32.mrb[13].mxu1 }
 0xe79   : > { %v3158_v32 = vsel %vm1203_vm2, %v3000_v27, -inf }
 0xe7a   : > { %3159 = vmax.xlane.f32.xlu1 %v3158_v32  ;;  %v3151_v26 = vpop.f32.mrb[14].mxu1  ;;  %3162 = vmax.xlane.f32.xlu0 %v3161_v33 }
 0xe7b   : > { %v3152_v36 = vadd.f32 %v5211_v62, %v3151_v26  ;;  %v4549_v34 = vpop.f32.mrb[15].mxu1 }
 0xe7d   : > { %v3164_v35 = vsel %vm1203_vm2, %v3152_v36, -inf }
 0xe7e   : > { %3165 = vmax.xlane.f32.xlu0 %v3164_v35 }
 0xe8b   : > { %2703 = vrot.lane.b32.xlu1 %v5417_v54, %s5855_s23 }
 0xf03   : > { %v3157_v37 = vpop.xlane.xlu0 %3156 }
 0xf04   : > { %v3167_v38 = vsub.f32 %v2924_v19, %v3157_v37 }
 0xf06   : > { %v3171_v39 = vmul.f32 1.442695, %v3167_v38 }
 0xf07   : > { %v3160_v40 = vpop.xlane.xlu1 %3159  ;;  %v3163_v42 = vpop.xlane.xlu0 %3162 }
 0xf08   : > { %4823 = vpow2.f32 %v3171_v39  ;;  %v3168_v43 = vsub.f32 %v3000_v27, %v3160_v40  ;;  %v3169_v44 = vsub.f32 %v3076_v22, %v3163_v42 }
 0xf0a   : > { %v3173_v45 = vmul.f32 1.442695, %v3168_v43  ;;  %v3175_v46 = vmul.f32 1.442695, %v3169_v44 }
 0xf0b   : > { %v3166_v47 = vpop.xlane.xlu0 %3165  ;;  %v2704_v58 = vpop.permute.xlu1 %2703 }
 0xf0c   : > { %4825 = vpow2.f32 %v3173_v45  ;;  %v3170_v62 = vsub.f32 %v3152_v36, %v3166_v47 }
 0xf0d   : > { %4827 = vpow2.f32 %v3175_v46 }
 0xf0e   : > { %v3177_v23 = vmul.f32 1.442695, %v3170_v62 }
 0xf10   : > { %4829 = vpow2.f32 %v3177_v23 }
 0xf12   : > { %v5509_v48 = vpop.eup %4823 }
 0xf13   : > { %v3179_v54 = vsel %vm1203_vm2, %v5509_v48, 0.0 }
 0xf14   : > { %3180 = vadd.xlane.f32.xlu1 %v3179_v54 }
 0xf16   : > { %v4826_v49 = vpop.eup %4825 }
 0xf17   : > { %v5513_v52 = vpop.eup %4827  ;;  %v3182_v53 = vsel %vm1203_vm2, %v4826_v49, 0.0 }
 0xf18   : > { %3183 = vadd.xlane.f32.xlu0 %v3182_v53  ;;  %v3185_v29 = vsel %vm1203_vm2, %v5513_v52, 0.0 }
 0xf19   : > { %3186 = vadd.xlane.f32.xlu1 %v3185_v29 }
 0xf1a   : > { %v5518_v56 = vpop.eup %4829 }
 0xf1b   : > { %v3188_v57 = vsel %vm1203_vm2, %v5518_v56, 0.0 }
 0xf1c   : > { %3189 = vadd.xlane.f32.xlu0 %v3188_v57 }
 0xf2a   : > { %2707 = vrot.lane.b32.xlu1 %v5427_v30, %s5855_s23 }
 0xf2e   : > { %2709 = vrot.lane.b32.xlu1 %v5435_v28, %s5855_s23 }
 0xf32   : > { %2705 = vrot.lane.b32.xlu0 %v5429_v55, %s5855_s23  ;;  %s5857_s23 = smov 8  }
 0xfa1   : > { %v3181_v59 = vpop.xlane.xlu1 %3180 }
 0xfa2   : > { %4831 = vrcp.f32 %v3181_v59 }
 0xfa5   : > { %v3184_v60 = vpop.xlane.xlu0 %3183 }
 0xfa6   : > { %v3187_v61 = vpop.xlane.xlu1 %3186  ;;  %4833 = vrcp.f32 %v3184_v60 }
 0xfa7   : > { %4835 = vrcp.f32 %v3187_v61 }
 0xfa9   : > { %v3190_v63 = vpop.xlane.xlu0 %3189 }
 0xfaa   : > { %v2708_v0 = vpop.permute.xlu1 %2707  ;;  %4837 = vrcp.f32 %v3190_v63 }
 0xfab   : > { %v2715_v1 = vcombine.low %v2704_v58, %v2708_v0  ;;  %v2716_v2 = vcombine.high %v2704_v58, %v2708_v0 }
 0xfac   : > { %v4832_v33 = vpop.eup %4831 }
 0xfad   : > { %v2706_v3 = vpop.permute.xlu0 %2705  ;;  %v2723_v30 = vrot.slane %v2715_v1, %v5147_v41  ;;  %v2730_v7 = vrot.slane %v2716_v2, %v5147_v41  ;;  %v3195_v44 = vmul.f32 %v4832_v33, %v5509_v48  ;;  %v4288_v48 = vld [vmem:[%s5804_s6 + $0x20] sm:$0xff] }
 0xfae   : > { %v2710_v4 = vpop.permute.xlu1 %2709 }
 0xfaf   : > { %v2731_v5 = vcombine.low %v2706_v3, %v2710_v4  ;;  %v2732_v6 = vcombine.high %v2706_v3, %v2710_v4 }
 0xfb0   : > { %v4834_v35 = vpop.eup %4833 }
 0xfb1   : > { %v2739_v28 = vrot.slane %v2731_v5, %v5147_v41  ;;  %v2746_v55 = vrot.slane %v2732_v6, %v5147_v41  ;;  %v4836_v43 = vpop.eup %4835  ;;  %v3196_v45 = vmul.f32 %v4834_v35, %v4826_v49  ;;  %v4289_v49 = vld [vmem:[%s5804_s6 + $0x28] sm:$0xff] }
 0xfb2   : > { %v3197_v23 = vmul.f32 %v4836_v43, %v5513_v52  ;;  %v4694_v52 = vpack.c.bf16 %v4289_v49, %v4288_v48 }
 0xfb3   : > { %v2747_v8 = vcombine.low %v2723_v30, %v2739_v28  ;;  %v2748_v9 = vcombine.high %v2723_v30, %v2739_v28  ;;  %v2763_v11 = vcombine.low %v2730_v7, %v2746_v55  ;;  %v2764_v12 = vcombine.high %v2730_v7, %v2746_v55 }
 0xfb4   : > { %v4838_v46 = vpop.eup %4837 }
 0xfb5   : > { %v2755_v14 = vrot.slane %v2747_v8, %v5157_v50  ;;  %v2762_v15 = vrot.slane %v2748_v9, %v5157_v50  ;;  %v2771_v16 = vrot.slane %v2763_v11, %v5157_v50  ;;  %v2778_v17 = vrot.slane %v2764_v12, %v5157_v50  ;;  %v4290_v8 = vld [vmem:[%s5804_s6 + $0x30] sm:$0xff]  ;;  %v4291_v9 = vld [vmem:[%s5804_s6 + $0x38] sm:$0xff] }
 0xfb6   : > { %v3198_v54 = vmul.f32 %v4838_v46, %v5518_v56 }
 0xfb7   : > { %v2783_v18 = vcombine.low %v2755_v14, %v2762_v15  ;;  %v4272_v19 = vcombine.high %v2755_v14, %v2762_v15  ;;  %v2799_v20 = vcombine.low %v2771_v16, %v2778_v17  ;;  %v4273_v21 = vcombine.high %v2771_v16, %v2778_v17 }
 0xfb8   : > { %v4697_v16 = vpack.c.bf16 %v4291_v9, %v4290_v8  ;;  %v4308_v8 = vld [vmem:[%s5810_s12 + $0x50] sm:$0xff]  ;;  %v4309_v9 = vld [vmem:[%s5810_s12 + $0x58] sm:$0xff] }
 0xfb9   : > { %v2790_v22 = vrot.slane %v2783_v18, %v5147_v41  ;;  %v2798_v24 = vrot.slane %v4272_v19, %v5147_v41  ;;  %v2806_v25 = vrot.slane %v2799_v20, %v5147_v41  ;;  %v2814_v27 = vrot.slane %v4273_v21, %v5147_v41 }
 0xfbb   : > { %v2815_v31 = vcombine.low %v2790_v22, %v2798_v24  ;;  %v2816_v32 = vcombine.high %v2790_v22, %v2798_v24  ;;  %v2831_v26 = vcombine.low %v2806_v25, %v2814_v27  ;;  %v2832_v36 = vcombine.high %v2806_v25, %v2814_v27 }
 0xfbd   : > { %v2823_v34 = vrot.slane %v2815_v31, %v5157_v50  ;;  %v2839_v37 = vrot.slane %v2831_v26, %v5157_v50  ;;  %v2830_v38 = vrot.slane %v2816_v32, %v5157_v50  ;;  %v2846_v39 = vrot.slane %v2832_v36, %v5157_v50 }
 0xfbf   : > { %v2847_v40 = vcombine.low %v2823_v34, %v2839_v37  ;;  %v2848_v42 = vcombine.high %v2823_v34, %v2839_v37  ;;  %v2849_v47 = vcombine.low %v2830_v38, %v2846_v39  ;;  %v2850_v62 = vcombine.high %v2830_v38, %v2846_v39 }
 0xfc1   : > { %4551 = vmatpush3.msra.mxu0 %v2847_v40  ;;  %4556 = vmatpush3.msra.mxu1 %v2848_v42 }
 0xfc2   : > { %4553 = vmatmul.mubr.msk.f32.vlgmr.msra.gmra.mrb[18].mxu0 %vm1203_vm2, %v3195_v44  ;;  %4558 = vmatmul.mubr.msk.f32.vlgmr.msra.gmra.mrb[16].mxu1 %vm1203_vm2, %v3196_v45 }
 0xfc3   : > { %4560 = vmatprep.subr.mxu0 %v4911_v13  ;;  %4565 = vmatprep.subr.mxu1 %v4911_v13 }
 0xfc4   : > { %4561 = vmatpush3.msra.mxu0 %v2849_v47  ;;  %4566 = vmatpush3.msra.mxu1 %v2850_v62 }
 0xfc5   : > { %4562 = vmatprep.mubr.msk.f32.mxu0 %vm4910_vm1, %v4911_v13  ;;  %4567 = vmatprep.mubr.msk.f32.mxu1 %vm4910_vm1, %v4911_v13 }
 0xfc6   : > { %4563 = vmatmul.mubr.msk.f32.vlgmr.msra.gmra.mrb[20].mxu0 %vm1203_vm2, %v3197_v23  ;;  %4568 = vmatmul.mubr.msk.f32.vlgmr.msra.gmra.mrb[18].mxu1 %vm1203_vm2, %v3198_v54 }
 0xfc7   : > { %4693 = vmatprep.subr.bf16.mxu0 %v4909_v10  ;;  %4578 = vmatprep.mubr.msk.f32.mxu0 %vm4910_vm1, %v4911_v13 }
 0xfc8   : > { %4699 = vmatprep.subr.bf16.mxu1 %v4909_v10  ;;  %4589 = vmatprep.mubr.msk.f32.mxu1 %vm4910_vm1, %v4911_v13 }
 0xfc9   : > { %4695 = vmatpush3.bf16.msra.mxu0 %v4694_v52 }
 0xfca   : > { %4696 = vmatprep.subr.bf16.mxu0 %v4909_v10 }
 0xfcd   : > { %4698 = vmatpush3.bf16.msra.mxu0 %v4697_v16  ;;  %v4312_v16 = vld [vmem:[%s5810_s12 + $0x70] sm:$0xff] }
 0xfce   : > { %4705 = vmatprep.subr.bf16.mxu0 %v4909_v10 }
0x1095   : > { %v3268_v53 = vpop.f32.mrb[18].mxu0  ;;  %v3341_v29 = vpop.f32.mrb[16].mxu1 }
0x1096   : > { %v4554_v56 = vpop.f32.mrb[19].mxu0  ;;  %v4559_v57 = vpop.f32.mrb[17].mxu1 }
0x1097   : > { %v4299_v57 = vld [vmem:[%s5808_s10 + $0x20] sm:$0xff] }
0x1099   : > { %v3414_v58 = vpop.f32.mrb[20].mxu0  ;;  %v3487_v59 = vpop.f32.mrb[18].mxu1 }
0x109a   : > { %v3491_v60 = vcombine.low %v3268_v53, %v3414_v58  ;;  %v3492_v61 = vcombine.high %v3268_v53, %v3414_v58  ;;  %v3507_v63 = vcombine.low %v3341_v29, %v3487_v59  ;;  %v3508_v0 = vcombine.high %v3341_v29, %v3487_v59  ;;  %v4564_v1 = vpop.f32.mrb[21].mxu0  ;;  %v4569_v2 = vpop.f32.mrb[19].mxu1  ;;  %v4300_v58 = vld [vmem:[%s5808_s10 + $0x28] sm:$0xff] }
0x109b   : > { %v4700_v59 = vpack.c.bf16 %v4300_v58, %v4299_v57  ;;  %v4056_v58 = vld [vmem:[%s5816_s18] sm:$0xff] }
0x109c   : > { %v3499_v3 = vrot.slane %v3491_v60, %v5147_v41  ;;  %v3506_v4 = vrot.slane %v3492_v61, %v5147_v41  ;;  %v3515_v5 = vrot.slane %v3507_v63, %v5147_v41  ;;  %v3522_v6 = vrot.slane %v3508_v0, %v5147_v41  ;;  %v4302_v60 = vld [vmem:[%s5808_s10 + $0x38] sm:$0xff] }
0x109d   : > { %4701 = vmatpush3.bf16.msra.mxu1 %v4700_v59  ;;  %v4057_v59 = vld [vmem:[%s5816_s18 + $0x8] sm:$0xff] }
0x109e   : > { %v3523_v30 = vcombine.low %v3499_v3, %v3515_v5  ;;  %v3524_v7 = vcombine.high %v3499_v3, %v3515_v5  ;;  %v3539_v28 = vcombine.low %v3506_v4, %v3522_v6  ;;  %v3540_v55 = vcombine.high %v3506_v4, %v3522_v6  ;;  %4702 = vmatprep.subr.bf16.mxu1 %v4909_v10  ;;  %v4297_v3 = vld [vmem:[%s5806_s8 + $0x1] ss:$0 sm:$0xff] }
0x109f   : > { %v4298_v5 = vld [vmem:[%s5807_s9 + $0x1] ss:$0 sm:$0xff] }
0x10a0   : > { %v3531_v11 = vrot.slane %v3523_v30, %v5157_v50  ;;  %v3538_v12 = vrot.slane %v3524_v7, %v5157_v50  ;;  %v3547_v14 = vrot.slane %v3539_v28, %v5157_v50  ;;  %v3554_v15 = vrot.slane %v3540_v55, %v5157_v50  ;;  %v4306_v7 = vld [vmem:[%s5810_s12 + $0x40] sm:$0xff]  ;;  %v4307_v28 = vld [vmem:[%s5810_s12 + $0x48] sm:$0xff] }
0x10a1   : > { %v4706_v55 = vpack.c.bf16 %v4307_v28, %v4306_v7  ;;  %v4064_v7 = vld [vmem:[%s5816_s18 + $0x40] sm:$0xff]  ;;  %v4065_v28 = vld [vmem:[%s5816_s18 + $0x48] sm:$0xff] }
0x10a2   : > { %v3559_v17 = vcombine.low %v3531_v11, %v3538_v12  ;;  %v4286_v18 = vcombine.high %v3531_v11, %v3538_v12  ;;  %v3575_v19 = vcombine.low %v3547_v14, %v3554_v15  ;;  %v4287_v20 = vcombine.high %v3547_v14, %v3554_v15  ;;  %v4310_v12 = vld [vmem:[%s5810_s12 + $0x60] sm:$0xff]  ;;  %v4311_v14 = vld [vmem:[%s5810_s12 + $0x68] sm:$0xff] }
0x10a3   : > { %v4709_v11 = vpack.c.bf16 %v4309_v9, %v4308_v8  ;;  %v4712_v15 = vpack.c.bf16 %v4311_v14, %v4310_v12  ;;  %v4066_v8 = vld [vmem:[%s5816_s18 + $0x50] sm:$0xff]  ;;  %v4067_v9 = vld [vmem:[%s5816_s18 + $0x58] sm:$0xff]  ;;  %v4068_v12 = vld [vmem:[%s5816_s18 + $0x60] sm:$0xff] }
0x10a4   : > { %v3566_v21 = vrot.slane %v3559_v17, %v5147_v41  ;;  %v3574_v22 = vrot.slane %v4286_v18, %v5147_v41  ;;  %v3582_v24 = vrot.slane %v3575_v19, %v5147_v41  ;;  %v3590_v25 = vrot.slane %v4287_v20, %v5147_v41  ;;  %v4313_v17 = vld [vmem:[%s5810_s12 + $0x78] sm:$0xff]  ;;  %v4304_v19 = vld [vmem:[%s5809_s11 + $0x1] ss:$0 sm:$0xff]  ;;  %v4069_v14 = vld [vmem:[%s5816_s18 + $0x68] sm:$0xff] }
0x10a5   : > { %v4715_v18 = vpack.c.bf16 %v4313_v17, %v4312_v16  ;;  %v4070_v16 = vld [vmem:[%s5816_s18 + $0x70] sm:$0xff]  ;;  %v4071_v17 = vld [vmem:[%s5816_s18 + $0x78] sm:$0xff] }
0x10a6   : > { %v3592_v27 = vcombine.high %v3566_v21, %v3574_v22  ;;  %v3608_v31 = vcombine.high %v3582_v24, %v3590_v25  ;;  %v3591_v32 = vcombine.low %v3566_v21, %v3574_v22  ;;  %v3607_v33 = vcombine.low %v3582_v24, %v3590_v25 }
0x10a8   : > { %v3606_v26 = vrot.slane %v3592_v27, %v5157_v50  ;;  %v3622_v36 = vrot.slane %v3608_v31, %v5157_v50  ;;  %v3599_v34 = vrot.slane %v3591_v32, %v5157_v50  ;;  %v3615_v35 = vrot.slane %v3607_v33, %v5157_v50  ;;  %v4293_v50 = vld [vmem:[%s5805_s7 + $0x1] ss:$0 sm:$0xff] }
0x10aa   : > { %v3625_v37 = vcombine.low %v3606_v26, %v3622_v36  ;;  %v3624_v38 = vcombine.high %v3599_v34, %v3615_v35  ;;  %v3626_v39 = vcombine.high %v3606_v26, %v3622_v36  ;;  %v3623_v40 = vcombine.low %v3599_v34, %v3615_v35  ;;  %v4315_v35 = vld [vmem:[%s5811_s13 + $0x1] ss:$0 sm:$0xff] }
0x10ac   : > { %3632 = vrot.lane.b32.xlu1 %v3625_v37, %s5856_s26  ;;  %3628 = vrot.lane.b32.xlu0 %v3624_v38, %s5857_s23  ;;  %s5756_s23 = scalar_lea.hbm %s5818_s20, %s4322_s25 }
0x10b0   : > { %3636 = vrot.lane.b32.xlu0 %v3626_v39, %s5858_s28  ;;  %s4145_s28 = scalar_lea.sflag [#allocation3], %s629_s29 }
0x111e   : > { %v3629_v41 = vpop.permute.xlu0 %3628  ;;  %v3633_v42 = vpop.permute.xlu1 %3632 }
0x111f   : > { %v3639_v43 = vsel %vm1203_vm2, %v3623_v40, %v3629_v41 }
0x1120   : > { %v3640_v45 = vsel %vm1993_vm3, %v3639_v43, %v3633_v42 }
0x1122   : > { %v3637_v44 = vpop.permute.xlu0 %3636 }
0x1123   : > { %v3641_v46 = vsel %vm1995_vm4, %v3640_v45, %v3637_v44 }
0x1124   : > { %4579 = vmatmul.mubr.msk.f32.vlgmr.msra.gmra.mrb[22].mxu0 %vm641_vm0, %v3641_v46 }
0x1125   : > { %4608 = vmatprep.mubr.msk.f32.mxu0 %vm4910_vm1, %v4911_v13  ;;  %4707 = vmatpush3.bf16.msra.mxu0 %v4706_v55  ;;  %v4736_v55 = vpack.c.bf16 %v4065_v28, %v4064_v7 }
0x1126   : > { %4708 = vmatprep.subr.bf16.mxu0 %v4909_v10 }
0x1129   : > { %4710 = vmatpush3.bf16.msra.mxu0 %v4709_v11  ;;  %v4739_v11 = vpack.c.bf16 %v4067_v9, %v4066_v8 }
0x112a   : > { %4711 = vmatprep.subr.bf16.mxu0 %v4909_v10 }
0x112d   : > { %4713 = vmatpush3.bf16.msra.mxu0 %v4712_v15  ;;  %v4742_v15 = vpack.c.bf16 %v4069_v14, %v4068_v12 }
0x112e   : > { %4714 = vmatprep.subr.bf16.mxu0 %v4909_v10 }
0x1131   : > { %4716 = vmatpush3.bf16.msra.mxu0 %v4715_v18  ;;  %v4745_v18 = vpack.c.bf16 %v4071_v17, %v4070_v16 }
0x11f7   : > { %v3724_v47 = vpop.f32.mrb[22].mxu0 }
0x11f8   : > { %v3725_v62 = vadd.f32 %v4293_v50, %v3724_v47  ;;  %v4580_v23 = vpop.f32.mrb[23].mxu0  ;;  %v3977_v50 = vld [vmem:[%s5814_s16] sm:$0xff]  ;;  %v3978_v47 = vld [vmem:[%s5814_s16 + $0x8] sm:$0xff] }
0x11f9   : > { %v3979_v23 = vld [vmem:[%s5814_s16 + $0x10] sm:$0xff] }
0x11fa   : > { %v3728_v54 = vadd.f32 %v3725_v62, %v5408_v51  ;;  %v4301_v51 = vld [vmem:[%s5808_s10 + $0x30] sm:$0xff]  ;;  %v4718_v62 = vpack.c.bf16 %v3978_v47, %v3977_v50 }
0x11fb   : > { %v4703_v61 = vpack.c.bf16 %v4302_v60, %v4301_v51  ;;  %v4320_v51 = vld [vmem:[%s5813_s15 + $0x1] ss:$0 sm:$0xff] }
0x11fc   : > { %v3733_v48 = vsel %vm641_vm0, %v3728_v54, 0.0 }
0x11fd   : > { %3734 = vadd.xlane.f32.xlu1 %v3733_v48  ;;  %4704 = vmatpush3.bf16.msra.mxu1 %v4703_v61  ;;  %v4724_v61 = vpack.c.bf16 %v4057_v59, %v4056_v58 }
0x11fe   : > { %4717 = vmatprep.subr.bf16.mxu1 %v4909_v10 }
0x128a   : > { %v3735_v49 = vpop.xlane.xlu1 %3734 }
0x128b   : > { %v3736_v52 = vmul.f32 0.03125, %v3735_v49 }
0x128d   : > { %v3737_v53 = vsub.f32 %v3728_v54, %v3736_v52  ;;  %v3980_v54 = vld [vmem:[%s5814_s16 + $0x18] sm:$0xff] }
0x128e   : > { %v4721_v48 = vpack.c.bf16 %v3980_v54, %v3979_v23 }
0x128f   : > { %v3738_v29 = vmul.f32 %v3737_v53, %v3737_v53 }
0x1291   : > { %v3739_v56 = vsel %vm641_vm0, %v3738_v29, 0.0 }
0x1292   : > { %3740 = vadd.xlane.f32.xlu0 %v3739_v56  ;;  %v4319_v56 = vld [vmem:[%s5812_s14 + $0x1] ss:$0 sm:$0xff] }
0x131f   : > { %v3741_v63 = vpop.xlane.xlu0 %3740 }
0x1320   : > { %v3742_v0 = vmul.f32 0.03125, %v3741_v63 }
0x1322   : > { %v3743_v1 = vadd.f32 1e-12, %v3742_v0  ;;  %v4058_v0 = vld [vmem:[%s5816_s18 + $0x10] sm:$0xff] }
0x1324   : > { %4839 = vrsqrt.f32 %v3743_v1  ;;  %v4059_v1 = vld [vmem:[%s5816_s18 + $0x18] sm:$0xff] }
0x132e   : > { %v4840_v2 = vpop.eup %4839 }
0x132f   : > { %v3745_v4 = vmul.f32 %v4840_v2, %v3737_v53  ;;  %v4727_v2 = vpack.c.bf16 %v4059_v1, %v4058_v0 }
0x1331   : > { %v3752_v6 = vmul.f32 %v4297_v3, %v3745_v4  ;;  %v4060_v3 = vld [vmem:[%s5816_s18 + $0x20] sm:$0xff]  ;;  %v4061_v4 = vld [vmem:[%s5816_s18 + $0x28] sm:$0xff] }
0x1333   : > { %v3759_v30 = vadd.f32 %v4298_v5, %v3752_v6  ;;  %v4730_v5 = vpack.c.bf16 %v4061_v4, %v4060_v3  ;;  %v4062_v6 = vld [vmem:[%s5816_s18 + $0x30] sm:$0xff] }
0x1335   : > { %4590 = vmatmul.mubr.msk.f32.vlgmr.msra.gmra.mrb[20].mxu1 %vm641_vm0, %v3759_v30 }
0x1336   : > { %4619 = vmatprep.mubr.msk.f32.mxu1 %vm4910_vm1, %v4911_v13  ;;  %4719 = vmatpush3.bf16.msra.mxu1 %v4718_v62 }
0x1337   : > { %4720 = vmatprep.subr.bf16.mxu1 %v4909_v10 }
0x133a   : > { %4722 = vmatpush3.bf16.msra.mxu1 %v4721_v48 }
0x133b   : > { %4723 = vmatprep.subr.bf16.mxu1 %v4909_v10 }
0x1408   : > { %v3842_v20 = vpop.f32.mrb[20].mxu1 }
0x1409   : > { %v3843_v21 = vadd.f32 %v4304_v19, %v3842_v20  ;;  %v4591_v22 = vpop.f32.mrb[21].mxu1  ;;  %v3981_v19 = vld [vmem:[%s5815_s17] sm:$0x1] }
0x140b   : > { %v3847_v24 = vmul.f32 0.044715, %v3843_v21  ;;  %v3846_v26 = vmul.f32 0.5, %v3843_v21 }
0x140d   : > { %v3848_v25 = vmul.f32 %v3847_v24, %v3843_v21 }
0x140f   : > { %v3849_v27 = vmul.f32 %v3848_v25, %v3843_v21 }
0x1411   : > { %v3850_v31 = vadd.f32 %v3849_v27, %v3843_v21 }
0x1413   : > { %v3851_v32 = vmul.f32 0.7978846, %v3850_v31 }
0x1415   : > { %4841 = vtanh.f32 %v3851_v32 }
0x141f   : > { %v4842_v33 = vpop.eup %4841 }
0x1420   : > { %v3853_v36 = vadd.f32 1.0, %v4842_v33 }
0x1422   : > { %v3854_v34 = vmul.f32 %v3853_v36, %v3846_v26 }
0x1424   : > { %4609 = vmatmul.mubr.msk.f32.vlgmr.msra.gmra.mrb[24].mxu0 %vm2219_vm5, %v3854_v34 }
0x14f7   : > { %v3941_v37 = vpop.f32.mrb[24].mxu0 }
0x14f8   : > { %v3942_v38 = vadd.f32 %v4315_v35, %v3941_v37  ;;  %v4610_v39 = vpop.f32.mrb[25].mxu0 }
0x14fa   : > { %v3945_v40 = vadd.f32 %v3942_v38, %v3759_v30 }
0x14fc   : > { %v3950_v41 = vsel %vm641_vm0, %v3945_v40, 0.0 }
0x14fd   : > { %3951 = vadd.xlane.f32.xlu0 %v3950_v41 }
0x158a   : > { %v3952_v42 = vpop.xlane.xlu0 %3951 }
0x158b   : > { %v3953_v43 = vmul.f32 0.03125, %v3952_v42 }
0x158d   : > { %v3954_v44 = vsub.f32 %v3945_v40, %v3953_v43 }
0x158f   : > { %v3955_v45 = vmul.f32 %v3954_v44, %v3954_v44 }
0x1591   : > { %v3956_v46 = vsel %vm641_vm0, %v3955_v45, 0.0 }
0x1592   : > { %3957 = vadd.xlane.f32.xlu1 %v3956_v46 }
0x161f   : > { %v3958_v49 = vpop.xlane.xlu1 %3957 }
0x1620   : > { %v3959_v52 = vmul.f32 0.03125, %v3958_v49 }
0x1622   : > { %v3960_v53 = vadd.f32 1e-12, %v3959_v52 }
0x1624   : > { %4843 = vrsqrt.f32 %v3960_v53 }
0x162e   : > { %v4844_v29 = vpop.eup %4843 }
0x162f   : > { %v3962_v57 = vmul.f32 %v4844_v29, %v3954_v44 }
0x1631   : > { %v3969_v60 = vmul.f32 %v4319_v56, %v3962_v57 }
0x1633   : > { %v3976_v63 = vadd.f32 %v4320_v51, %v3969_v60 }
0x1635   : > { %4620 = vmatmul.mubr.msk.f32.vlgmr.msra.gmra.mrb[22].mxu1 %vm641_vm0, %v3976_v63 }
0x1636   : > { %4725 = vmatpush3.bf16.msra.mxu1 %v4724_v61  ;;  %4654 = vmatprep.mubr.msk.f32.mxu1 %vm4910_vm1, %v4911_v13  ;;  %v4063_v13 = vld [vmem:[%s5816_s18 + $0x38] sm:$0xff] }
0x1637   : > { %4726 = vmatprep.subr.bf16.mxu1 %v4909_v10  ;;  %v4733_v30 = vpack.c.bf16 %v4063_v13, %v4062_v6 }
0x163a   : > { %4728 = vmatpush3.bf16.msra.mxu1 %v4727_v2 }
0x163b   : > { %4729 = vmatprep.subr.bf16.mxu1 %v4909_v10 }
0x163e   : > { %4731 = vmatpush3.bf16.msra.mxu1 %v4730_v5 }
0x163f   : > { %4732 = vmatprep.subr.bf16.mxu1 %v4909_v10 }
0x1642   : > { %4734 = vmatpush3.bf16.msra.mxu1 %v4733_v30 }
0x1643   : > { %4735 = vmatprep.subr.bf16.mxu1 %v4909_v10 }
0x1646   : > { %4737 = vmatpush3.bf16.msra.mxu1 %v4736_v55 }
0x1647   : > { %4738 = vmatprep.subr.bf16.mxu1 %v4909_v10 }
0x164a   : > { %4740 = vmatpush3.bf16.msra.mxu1 %v4739_v11 }
0x164b   : > { %4741 = vmatprep.subr.bf16.mxu1 %v4909_v10 }
0x164e   : > { %4743 = vmatpush3.bf16.msra.mxu1 %v4742_v15 }
0x164f   : > { %4744 = vmatprep.subr.bf16.mxu1 %v4909_v10  ;;  %v4072_v10 = vld [vmem:[%s5817_s19] sm:$0x1] }
0x1652   : > { %4746 = vmatpush3.bf16.msra.mxu1 %v4745_v18 }
0x1708   : > { %v4051_v20 = vpop.f32.mrb[22].mxu1 }
0x1709   : > { %v4052_v21 = vadd.f32 %v4051_v20, %v3981_v19  ;;  %v4621_v22 = vpop.f32.mrb[23].mxu1 }
0x170b   : > { %v4055_v24 = vmax.f32 %v4052_v21, 0.0 }
0x170d   : > { %4655 = vmatmul.mubr.f32.vlgmr.msra.gmra.mrb[24].mxu1 %v4055_v24 }
0x17e0   : > { %v4139_v25 = vpop.f32.mrb[24].mxu1 }
0x17e1   : > { %v4140_v27 = vadd.f32 %v4139_v25, %v4072_v10  ;;  %v4656_v31 = vpop.f32.mrb[25].mxu1 }
0x17e3   : > { %4143 = vst [vmem:[%s630_s30] sm:$0x1] %v4140_v27 }
0x17e4   : > { %4858 = shalt.err (!%p4855_p3)
}
0x17e5   : > { %s4859_s29 = scalar_lea.hbm %s5756_s23, 16  ;;  %s4863_s0 = scalar_lea.hbm %s5818_s20, 32 }
0x17e6   : > { %p4860_p4 = scmp.ne.s32.totalorder %s5756_s23, %s4859_s29  ;;  %p4864_p9 = scmp.lt.u32.totalorder %s5756_s23, %s5818_s20 }
0x17e7   : > { %p4865_p10 = scmp.lt.u32.totalorder %s4863_s0, %s4859_s29  ;;  %p4867_p12 = scmp.lt.u32.totalorder %s4859_s29, %s5756_s23 }
0x17e8   : > { %p4861_p7 = pnand %p4860_p4, %p5066_p5 }
0x17e9   : > { %p4866_p11 = por %p4865_p10, %p4864_p9 }
0x17ea   : > { %p4862_p8 = pneg %p4861_p7 }
0x17eb   : > { %p4868_p13 = por %p4867_p12, %p4866_p11 }
0x17ed   : > { %p4869_p0 = pnand %p4868_p13, %p4862_p8 }
0x17ef   : > { %4872 = shalt.err (!%p4869_p0)
}
0x17f0   : > { %4747 = dma.vmem_to_hbm [thread:$0]  (%p5066_p5), %s5758_s1, 16, %s5756_s23, %s4145_s28  }
0x17f1 PF: > { %s5859_s3 = sld [smem:[#allocation5_spill]]  ;;  %p4753_p1 = scmp.ge.s32.totalorder %s4907_s24, 2 }
0x17f3   : > { %p4750_p2 = pnand %p4753_p1, %p5070_p6 }
0x17f7   : > { %s4169_s21 = sand.u32 1, %s5859_s3  }
0x17f8   : > { %s4170_s25 = scalar_lea.sflag [#allocation3], %s4169_s21 }
0x17f9   : > { %4890 = dma.done.wait (!%p4750_p2), %s4170_s25, 16  }
0x17fa   : > { %4892 = vsyncadd (!%p4750_p2), %s4170_s25, 4294967280  ;;  %s5861_s24 = sld [smem:[#allocation7_spill]]  ;;  %s5862_s29 = sld [smem:[#allocation6_spill]] }
0x17fb   : > { %s5863_s23 = sld [smem:[#allocation8_spill]]  ;;  %s5864_s1 = smov %s4899_s22 }
0x1800   : > { %p30_p3 = scmp.ge.s32.totalorder %s5861_s24, 4   ;;  %s5865_s22 = smov %s5862_s29 }
0x1802   :  { %32 = sbr.rel (!%p30_p3) target bundleno = 9 (0x9), region = 150 }
0x1809   :  { %4174 = vsyncpa [#allocation3], 1 }
0x180a   :  { %4176 = vsyncpa [#allocation3 + $0x1], 1 }

</bundles_post_ra>
